<compile_context>
chip_gen: v5e
topology: v5e:2x2
jax: 0.10.0
libtpu: 0.0.40
codegen_flags: <defaults>
</compile_context>

<pallas_src>
import math

import jax
import jax.numpy as jnp
from jax.experimental import pallas as pl
from jax.experimental.pallas import tpu as pltpu


# ----------------------------------------------------------------------------
# Fused kernel: per-chunk input projection + LSTM recurrence + merged heads.
# grid = (T // T_CHUNK,), sequential ("arbitrary"); h/c live in VMEM scratch.
# ----------------------------------------------------------------------------
def _fused_kernel(x_ref, win_ref, bin_ref, wih_ref, bias_ref, whh_ref,
                  w1_ref, b1_ref, w2_ref, b2_ref, w3_ref, b3_ref,
                  out_ref, hn_ref, cn_ref, h_sc, c_sc, hs_sc):
    t = pl.program_id(0)

    @pl.when(t == 0)
    def _():
        h_sc[...] = jnp.zeros_like(h_sc)
        c_sc[...] = jnp.zeros_like(c_sc)

    B, H = h_sc.shape
    t_chunk = hs_sc.shape[0] // B

    # ---- hoisted, chunk-batched input path --------------------------------
    # One (Nc, F) @ (F, H) and one (Nc, H) @ (H, 4H) MXU matmul per chunk
    # instead of two tiny matmuls per timestep.  b_ih + b_hh already fused.
    x0 = jnp.maximum(
        jnp.dot(x_ref[...], win_ref[...], preferred_element_type=jnp.float32)
        + bin_ref[...], 0.0)                                   # (Nc, H)
    gx = (jnp.dot(x0, wih_ref[...], preferred_element_type=jnp.float32)
          + bias_ref[...])                                     # (Nc, 4H)

    # ---- sequential LSTM recurrence over the chunk (statically unrolled) ---
    # Only the (B,H)@(H,4H) recurrent matmul + gate nonlinearities remain on
    # the per-step critical path.  Gate order: i, f, g, o (cuDNN / PyTorch).
    # NOTE: with H < 128 the gate slices cut inside a vreg (lane shuffles);
    # choosing H as a multiple of 128 at scale makes these free aligned views.
    for s in range(t_chunk):
        gates = gx[s * B:(s + 1) * B, :] + jnp.dot(
            h_sc[...], whh_ref[...], preferred_element_type=jnp.float32)
        i = jax.nn.sigmoid(gates[:, 0:H])
        f = jax.nn.sigmoid(gates[:, H:2 * H])
        g = jnp.tanh(gates[:, 2 * H:3 * H])
        o = jax.nn.sigmoid(gates[:, 3 * H:4 * H])
        c_new = f * c_sc[...] + i * g
        h_new = o * jnp.tanh(c_new)
        c_sc[...] = c_new
        h_sc[...] = h_new
        hs_sc[s * B:(s + 1) * B, :] = h_new

    # ---- all heads, batched over the whole chunk ---------------------------
    # Per-head (H->128->64->1) MLPs merged into block(-diagonal) matrices, so
    # the head output is one dense (Nc, n_out) slab: no per-head width-1
    # stores, no out_lstm round trip through HBM.
    hs = hs_sc[...]                                            # (Nc, H)
    a = jnp.maximum(
        jnp.dot(hs, w1_ref[...], preferred_element_type=jnp.float32)
        + b1_ref[...], 0.0)                                    # (Nc, n_out*h1)
    a = jnp.maximum(
        jnp.dot(a, w2_ref[...], preferred_element_type=jnp.float32)
        + b2_ref[...], 0.0)                                    # (Nc, n_out*h2)
    out_ref[...] = (jnp.dot(a, w3_ref[...], preferred_element_type=jnp.float32)
                    + b3_ref[...])                             # (Nc, n_out)

    # hn / cn written once, on the last chunk only.
    @pl.when(t == pl.num_programs(0) - 1)
    def _():
        hn_ref[0] = h_sc[...]
        cn_ref[0] = c_sc[...]


def _pick_time_chunk(T, B, max_rows=512):
    """Largest divisor of T whose (tc*B)-row blocks satisfy the 8-row tiling
    rule and stay within a modest VMEM row budget (sized against the explicit
    vmem_limit_bytes below)."""
    best = None
    for tc in range(1, T + 1):
        if T % tc:
            continue
        rows = tc * B
        if rows > max_rows:
            break
        if rows % 8 == 0 or rows == T * B:
            best = tc
    if best is None:
        best = T   # single chunk; block == full array trivially satisfies tiling
    return best


def _run_fused(x2d, win_t, bin_, wih_t, bias, whh_t,
               w1_all, b1_all, w2_bd, b2_all, w3_bd, b3_all, *, B, T_CHUNK):
    N, F = x2d.shape
    H = win_t.shape[1]
    n_out = w3_bd.shape[1]
    Nc = T_CHUNK * B
    assert N % Nc == 0
    n_chunks = N // Nc

    const2 = lambda t: (0, 0)
    out_shapes = (
        jax.ShapeDtypeStruct((N, n_out), jnp.float32),   # flattened final
        jax.ShapeDtypeStruct((1, B, H), jnp.float32),    # hn
        jax.ShapeDtypeStruct((1, B, H), jnp.float32),    # cn
    )
    return pl.pallas_call(
        _fused_kernel,
        out_shape=out_shapes,
        grid=(n_chunks,),
        in_specs=[
            pl.BlockSpec((Nc, F), lambda t: (t, 0)),          # x, one time chunk
            pl.BlockSpec((F, H), const2),                     # linearIn W^T
            pl.BlockSpec((1, H), const2),                     # linearIn bias
            pl.BlockSpec((H, 4 * H), const2),                 # W_ih^T
            pl.BlockSpec((1, 4 * H), const2),                 # b_ih + b_hh fused
            pl.BlockSpec((H, 4 * H), const2),                 # W_hh^T
            pl.BlockSpec(w1_all.shape, const2),               # heads W1 (merged)
            pl.BlockSpec(b1_all.shape, const2),
            pl.BlockSpec(w2_bd.shape, const2),                # heads W2 (block diag)
            pl.BlockSpec(b2_all.shape, const2),
            pl.BlockSpec(w3_bd.shape, const2),                # heads W3 (block diag)
            pl.BlockSpec(b3_all.shape, const2),
        ],
        out_specs=(
            pl.BlockSpec((Nc, n_out), lambda t: (t, 0)),
            pl.BlockSpec((1, B, H), lambda t: (0, 0, 0)),
            pl.BlockSpec((1, B, H), lambda t: (0, 0, 0)),
        ),
        scratch_shapes=[
            pltpu.VMEM((B, H), jnp.float32),       # h state
            pltpu.VMEM((B, H), jnp.float32),       # c state
            pltpu.VMEM((Nc, H), jnp.float32),      # per-chunk hidden slab
        ],
        compiler_params=pltpu.CompilerParams(
            dimension_semantics=("arbitrary",),    # recurrence is sequential
            vmem_limit_bytes=32 * 1024 * 1024),
    )(x2d, win_t, bin_, wih_t, bias, whh_t,
      w1_all, b1_all, w2_bd, b2_all, w3_bd, b3_all)


# ----------------------------------------------------------------------------
# Wrapper: layout plumbing only (transposes / bias fusion / head merging).
# ----------------------------------------------------------------------------
def _block_diag(blocks):
    rows = sum(b.shape[0] for b in blocks)
    cols = sum(b.shape[1] for b in blocks)
    out = jnp.zeros((rows, cols), blocks[0].dtype)
    r = c = 0
    for b in blocks:
        out = out.at[r:r + b.shape[0], c:c + b.shape[1]].set(b)
        r += b.shape[0]
        c += b.shape[1]
    return out


def cudnn_lstm_model_multi_output(x, p):
    """Pallas forward: x (T, B, F) -> (T, B, n_out), plus (hn, cn)."""
    T, B, F = x.shape
    H = p["win"].shape[0]
    n_out, h1, _ = p["head_w1"].shape
    h2 = p["head_w2"].shape[1]

    win_t = jnp.transpose(p["win"])                        # (F, H)
    bin_ = p["bin"].reshape(1, H)
    wih_t = jnp.transpose(p["w_ih"])                       # (H, 4H)
    whh_t = jnp.transpose(p["w_hh"])                       # (H, 4H)
    bias = (p["b_ih"] + p["b_hh"]).reshape(1, 4 * H)       # fused LSTM biases

    # Merge the n_out independent SimpleAnn heads into block(-diagonal) mats.
    w1_all = jnp.concatenate(
        [jnp.transpose(p["head_w1"][k]) for k in range(n_out)], axis=1)  # (H, n_out*h1)
    b1_all = p["head_b1"].reshape(1, n_out * h1)
    w2_bd = _block_diag([jnp.transpose(p["head_w2"][k]) for k in range(n_out)])
    b2_all = p["head_b2"].reshape(1, n_out * h2)
    w3_bd = _block_diag([jnp.transpose(p["head_w3"][k]) for k in range(n_out)])
    b3_all = p["head_b3"].reshape(1, n_out)

    T_CHUNK = _pick_time_chunk(T, B)
    out2d, hn, cn = _run_fused(
        x.reshape(T * B, F), win_t, bin_, wih_t, bias, whh_t,
        w1_all, b1_all, w2_bd, b2_all, w3_bd, b3_all,
        B=B, T_CHUNK=T_CHUNK)

    final = out2d.reshape(T, B, n_out)
    return final, (hn, cn)


# ----------------------------------------------------------------------------
# Parameter construction (deterministic, mirrors the torch module's shapes)
# ----------------------------------------------------------------------------
def init_params(key, n_in, n_out, H, hidden=(128, 64)):
    ks = jax.random.split(key, 8 + 6 * n_out)
    u = lambda k, shape, bound: jax.random.uniform(
        k, shape, jnp.float32, -bound, bound)

    p = {}
    b_in = 1.0 / math.sqrt(n_in)
    p["win"] = u(ks[0], (H, n_in), b_in)
    p["bin"] = u(ks[1], (H,), b_in)
    b_h = 1.0 / math.sqrt(H)
    p["w_ih"] = u(ks[2], (4 * H, H), b_h)
    p["w_hh"] = u(ks[3], (4 * H, H), b_h)
    p["b_ih"] = u(ks[4], (4 * H,), b_h)
    p["b_hh"] = u(ks[5], (4 * H,), b_h)
    h1, h2 = hidden
    w1, b1, w2, b2, w3, b3 = [], [], [], [], [], []
    for i in range(n_out):
        kk = ks[8 + 6 * i: 8 + 6 * (i + 1)]
        w1.append(u(kk[0], (h1, H), 1.0 / math.sqrt(H)))
        b1.append(u(kk[1], (h1,), 1.0 / math.sqrt(H)))
        w2.append(u(kk[2], (h2, h1), 1.0 / math.sqrt(h1)))
        b2.append(u(kk[3], (h2,), 1.0 / math.sqrt(h1)))
        w3.append(u(kk[4], (1, h2), 1.0 / math.sqrt(h2)))
        b3.append(u(kk[5], (1,), 1.0 / math.sqrt(h2)))
    p["head_w1"] = jnp.stack(w1)   # (n_out, h1, H)
    p["head_b1"] = jnp.stack(b1)   # (n_out, h1)
    p["head_w2"] = jnp.stack(w2)   # (n_out, h2, h1)
    p["head_b2"] = jnp.stack(b2)   # (n_out, h2)
    p["head_w3"] = jnp.stack(w3)   # (n_out, 1, h2)
    p["head_b3"] = jnp.stack(b3)   # (n_out, 1)
    return p


# ----------------------------------------------------------------------------
# Pure-JAX reference (matches the PyTorch eval-mode forward)
# ----------------------------------------------------------------------------
def reference_forward(x, p):
    T, B, F = x.shape
    H = p["win"].shape[0]
    x0 = jax.nn.relu(jnp.einsum("tbf,hf->tbh", x, p["win"]) + p["bin"])

    def step(carry, xt):
        h, c = carry
        gates = (xt @ p["w_ih"].T + h @ p["w_hh"].T + p["b_ih"] + p["b_hh"])
        i = jax.nn.sigmoid(gates[:, 0:H])
        f = jax.nn.sigmoid(gates[:, H:2 * H])
        g = jnp.tanh(gates[:, 2 * H:3 * H])
        o = jax.nn.sigmoid(gates[:, 3 * H:4 * H])
        c = f * c + i * g
        h = o * jnp.tanh(c)
        return (h, c), h

    (hn, cn), out = jax.lax.scan(
        step, (jnp.zeros((B, H), jnp.float32), jnp.zeros((B, H), jnp.float32)), x0)

    outs = []
    n_out = p["head_w1"].shape[0]
    for i in range(n_out):
        a = jax.nn.relu(out @ p["head_w1"][i].T + p["head_b1"][i])
        a = jax.nn.relu(a @ p["head_w2"][i].T + p["head_b2"][i])
        outs.append(a @ p["head_w3"][i].T + p["head_b3"][i])
    final = jnp.concatenate(outs, axis=-1)
    return final, (hn[None], cn[None])


if __name__ == "__main__":
    # small shapes consistent with the module's (seq, batch, feature) forward
    T, B = 8, 4
    n_input_features = 8
    n_output_features = 3
    n_hidden_states = 32

    key = jax.random.PRNGKey(0)
    kx, kp = jax.random.split(key)
    x = jax.random.normal(kx, (T, B, n_input_features), dtype=jnp.float32)
    params = init_params(kp, n_input_features, n_output_features,
                         n_hidden_states, hidden=(128, 64))

    final, (hn, cn) = cudnn_lstm_model_multi_output(x, params)
    final = jax.block_until_ready(final)

    ref_final, (ref_hn, ref_cn) = reference_forward(x, params)
    assert final.shape == (T, B, n_output_features)
    assert jnp.allclose(final, ref_final, atol=1e-3, rtol=1e-3)
    assert jnp.allclose(hn, ref_hn, atol=1e-3, rtol=1e-3)
    assert jnp.allclose(cn, ref_cn, atol=1e-3, rtol=1e-3)

    print("KERNEL_OK")
</pallas_src>

<mosaic_0001>
module attributes {stable_mosaic.version = 11 : i64} {
  func.func @_fused_kernel(%arg0: i32, %arg1: memref<32x8xf32, #tpu.memory_space<vmem>>, %arg2: memref<8x32xf32, #tpu.memory_space<vmem>>, %arg3: memref<1x32xf32, #tpu.memory_space<vmem>>, %arg4: memref<32x128xf32, #tpu.memory_space<vmem>>, %arg5: memref<1x128xf32, #tpu.memory_space<vmem>>, %arg6: memref<32x128xf32, #tpu.memory_space<vmem>>, %arg7: memref<32x384xf32, #tpu.memory_space<vmem>>, %arg8: memref<1x384xf32, #tpu.memory_space<vmem>>, %arg9: memref<384x192xf32, #tpu.memory_space<vmem>>, %arg10: memref<1x192xf32, #tpu.memory_space<vmem>>, %arg11: memref<192x3xf32, #tpu.memory_space<vmem>>, %arg12: memref<1x3xf32, #tpu.memory_space<vmem>>, %arg13: memref<32x3xf32, #tpu.memory_space<vmem>>, %arg14: memref<1x4x32xf32, #tpu.memory_space<vmem>>, %arg15: memref<1x4x32xf32, #tpu.memory_space<vmem>>, %arg16: memref<4x32xf32, #tpu.memory_space<vmem>>, %arg17: memref<4x32xf32, #tpu.memory_space<vmem>>, %arg18: memref<32x32xf32, #tpu.memory_space<vmem>>) attributes {dimension_semantics = [#tpu.dimension_semantics<arbitrary>], iteration_bounds = array<i64: 1>, scalar_prefetch = 0 : i64, scratch_operands = 3 : i64, tpu.core_type = #tpu.core_type<tc>, window_params = [{transform_indices = @transform_0, window_bounds = array<i64: 32, 8>}, {pipeline_mode = #tpu.pipeline_mode<synchronous>, transform_indices = @transform_1, window_bounds = array<i64: 8, 32>}, {pipeline_mode = #tpu.pipeline_mode<synchronous>, transform_indices = @transform_2, window_bounds = array<i64: 1, 32>}, {pipeline_mode = #tpu.pipeline_mode<synchronous>, transform_indices = @transform_3, window_bounds = array<i64: 32, 128>}, {pipeline_mode = #tpu.pipeline_mode<synchronous>, transform_indices = @transform_4, window_bounds = array<i64: 1, 128>}, {pipeline_mode = #tpu.pipeline_mode<synchronous>, transform_indices = @transform_5, window_bounds = array<i64: 32, 128>}, {pipeline_mode = #tpu.pipeline_mode<synchronous>, transform_indices = @transform_6, window_bounds = array<i64: 32, 384>}, {pipeline_mode = #tpu.pipeline_mode<synchronous>, transform_indices = @transform_7, window_bounds = array<i64: 1, 384>}, {pipeline_mode = #tpu.pipeline_mode<synchronous>, transform_indices = @transform_8, window_bounds = array<i64: 384, 192>}, {pipeline_mode = #tpu.pipeline_mode<synchronous>, transform_indices = @transform_9, window_bounds = array<i64: 1, 192>}, {pipeline_mode = #tpu.pipeline_mode<synchronous>, transform_indices = @transform_10, window_bounds = array<i64: 192, 3>}, {pipeline_mode = #tpu.pipeline_mode<synchronous>, transform_indices = @transform_11, window_bounds = array<i64: 1, 3>}, {transform_indices = @transform_12, window_bounds = array<i64: 32, 3>}, {pipeline_mode = #tpu.pipeline_mode<synchronous>, transform_indices = @transform_13, window_bounds = array<i64: 1, 4, 32>}, {pipeline_mode = #tpu.pipeline_mode<synchronous>, transform_indices = @transform_14, window_bounds = array<i64: 1, 4, 32>}]} {
    %c0_i32 = arith.constant 0 : i32
    %0 = arith.cmpi eq, %arg0, %c0_i32 : i32
    %1 = arith.extui %0 : i1 to i32
    %c0_i32_0 = arith.constant 0 : i32
    %2 = arith.cmpi ne, %1, %c0_i32_0 : i32
    scf.if %2 {
      %cst_156 = arith.constant 0.000000e+00 : f32
      %312 = vector.broadcast %cst_156 : f32 to vector<4x32xf32>
      %c0_157 = arith.constant 0 : index
      %c0_158 = arith.constant 0 : index
      %313 = vector.load %arg16[%c0_157, %c0_158] : memref<4x32xf32, #tpu.memory_space<vmem>>, vector<4x32xf32>
      tpu.vector_store %arg16[%c0_157, %c0_158], %312 {strides = array<i32>} : memref<4x32xf32, #tpu.memory_space<vmem>>, vector<4x32xf32>,
      %cst_159 = arith.constant 0.000000e+00 : f32
      %314 = vector.broadcast %cst_159 : f32 to vector<4x32xf32>
      %c0_160 = arith.constant 0 : index
      %c0_161 = arith.constant 0 : index
      %315 = vector.load %arg17[%c0_160, %c0_161] : memref<4x32xf32, #tpu.memory_space<vmem>>, vector<4x32xf32>
      tpu.vector_store %arg17[%c0_160, %c0_161], %314 {strides = array<i32>} : memref<4x32xf32, #tpu.memory_space<vmem>>, vector<4x32xf32>,
    } else {
    }
    %c0 = arith.constant 0 : index
    %c0_1 = arith.constant 0 : index
    %3 = vector.load %arg1[%c0, %c0_1] : memref<32x8xf32, #tpu.memory_space<vmem>>, vector<32x8xf32>
    %c0_2 = arith.constant 0 : index
    %c0_3 = arith.constant 0 : index
    %4 = vector.load %arg2[%c0_2, %c0_3] : memref<8x32xf32, #tpu.memory_space<vmem>>, vector<8x32xf32>
    %cst = arith.constant dense<0.000000e+00> : vector<32x32xf32>
    %5 = tpu.matmul %3, %4, %cst {dimension_numbers = #tpu.dot_dimension_numbers<[1], [0], [0], [1], [0, 0, 1, 1], [], []>} : vector<32x8xf32>, vector<8x32xf32>, vector<32x32xf32> -> vector<32x32xf32>
    %c0_4 = arith.constant 0 : index
    %c0_5 = arith.constant 0 : index
    %6 = vector.load %arg3[%c0_4, %c0_5] : memref<1x32xf32, #tpu.memory_space<vmem>>, vector<1x32xf32>
    %7 = vector.broadcast %6 : vector<1x32xf32> to vector<32x32xf32>
    %8 = arith.addf %5, %7 : vector<32x32xf32>
    %cst_6 = arith.constant 0.000000e+00 : f32
    %9 = vector.broadcast %cst_6 : f32 to vector<32x32xf32>
    %10 = arith.maximumf %8, %9 : vector<32x32xf32>
    %c0_7 = arith.constant 0 : index
    %c0_8 = arith.constant 0 : index
    %11 = vector.load %arg4[%c0_7, %c0_8] : memref<32x128xf32, #tpu.memory_space<vmem>>, vector<32x128xf32>
    %cst_9 = arith.constant dense<0.000000e+00> : vector<32x128xf32>
    %12 = tpu.matmul %10, %11, %cst_9 {dimension_numbers = #tpu.dot_dimension_numbers<[1], [0], [0], [1], [0, 0, 1, 1], [], []>} : vector<32x32xf32>, vector<32x128xf32>, vector<32x128xf32> -> vector<32x128xf32>
    %c0_10 = arith.constant 0 : index
    %c0_11 = arith.constant 0 : index
    %13 = vector.load %arg5[%c0_10, %c0_11] : memref<1x128xf32, #tpu.memory_space<vmem>>, vector<1x128xf32>
    %14 = vector.broadcast %13 : vector<1x128xf32> to vector<32x128xf32>
    %15 = arith.addf %12, %14 : vector<32x128xf32>
    %16 = vector.extract_strided_slice %15 {offsets = [0, 0], sizes = [4, 128], strides = [1, 1]} : vector<32x128xf32> to vector<4x128xf32>
    %c0_12 = arith.constant 0 : index
    %c0_13 = arith.constant 0 : index
    %17 = vector.load %arg16[%c0_12, %c0_13] : memref<4x32xf32, #tpu.memory_space<vmem>>, vector<4x32xf32>
    %c0_14 = arith.constant 0 : index
    %c0_15 = arith.constant 0 : index
    %18 = vector.load %arg6[%c0_14, %c0_15] : memref<32x128xf32, #tpu.memory_space<vmem>>, vector<32x128xf32>
    %cst_16 = arith.constant dense<0.000000e+00> : vector<4x128xf32>
    %19 = tpu.matmul %17, %18, %cst_16 {dimension_numbers = #tpu.dot_dimension_numbers<[1], [0], [0], [1], [0, 0, 1, 1], [], []>} : vector<4x32xf32>, vector<32x128xf32>, vector<4x128xf32> -> vector<4x128xf32>
    %20 = arith.addf %16, %19 : vector<4x128xf32>
    %21 = vector.extract_strided_slice %20 {offsets = [0, 0], sizes = [4, 32], strides = [1, 1]} : vector<4x128xf32> to vector<4x32xf32>
    %22 = arith.negf %21 : vector<4x32xf32>
    %23 = math.exp %22 : vector<4x32xf32>
    %cst_17 = arith.constant 1.000000e+00 : f32
    %24 = vector.broadcast %cst_17 : f32 to vector<4x32xf32>
    %25 = arith.addf %24, %23 : vector<4x32xf32>
    %26 = arith.divf %24, %25 : vector<4x32xf32>
    %27 = vector.extract_strided_slice %20 {offsets = [0, 32], sizes = [4, 32], strides = [1, 1]} : vector<4x128xf32> to vector<4x32xf32>
    %28 = arith.negf %27 : vector<4x32xf32>
    %29 = math.exp %28 : vector<4x32xf32>
    %cst_18 = arith.constant 1.000000e+00 : f32
    %30 = vector.broadcast %cst_18 : f32 to vector<4x32xf32>
    %31 = arith.addf %30, %29 : vector<4x32xf32>
    %32 = arith.divf %30, %31 : vector<4x32xf32>
    %33 = vector.extract_strided_slice %20 {offsets = [0, 64], sizes = [4, 32], strides = [1, 1]} : vector<4x128xf32> to vector<4x32xf32>
    %34 = math.tanh %33 : vector<4x32xf32>
    %35 = vector.extract_strided_slice %20 {offsets = [0, 96], sizes = [4, 32], strides = [1, 1]} : vector<4x128xf32> to vector<4x32xf32>
    %36 = arith.negf %35 : vector<4x32xf32>
    %37 = math.exp %36 : vector<4x32xf32>
    %cst_19 = arith.constant 1.000000e+00 : f32
    %38 = vector.broadcast %cst_19 : f32 to vector<4x32xf32>
    %39 = arith.addf %38, %37 : vector<4x32xf32>
    %40 = arith.divf %38, %39 : vector<4x32xf32>
    %c0_20 = arith.constant 0 : index
    %c0_21 = arith.constant 0 : index
    %41 = vector.load %arg17[%c0_20, %c0_21] : memref<4x32xf32, #tpu.memory_space<vmem>>, vector<4x32xf32>
    %42 = arith.mulf %32, %41 : vector<4x32xf32>
    %43 = arith.mulf %26, %34 : vector<4x32xf32>
    %44 = arith.addf %42, %43 : vector<4x32xf32>
    %45 = math.tanh %44 : vector<4x32xf32>
    %46 = arith.mulf %40, %45 : vector<4x32xf32>
    %c0_22 = arith.constant 0 : index
    %c0_23 = arith.constant 0 : index
    %47 = vector.load %arg17[%c0_22, %c0_23] : memref<4x32xf32, #tpu.memory_space<vmem>>, vector<4x32xf32>
    tpu.vector_store %arg17[%c0_22, %c0_23], %44 {strides = array<i32>} : memref<4x32xf32, #tpu.memory_space<vmem>>, vector<4x32xf32>,
    %c0_24 = arith.constant 0 : index
    %c0_25 = arith.constant 0 : index
    %48 = vector.load %arg16[%c0_24, %c0_25] : memref<4x32xf32, #tpu.memory_space<vmem>>, vector<4x32xf32>
    tpu.vector_store %arg16[%c0_24, %c0_25], %46 {strides = array<i32>} : memref<4x32xf32, #tpu.memory_space<vmem>>, vector<4x32xf32>,
    %c0_26 = arith.constant 0 : index
    %c0_27 = arith.constant 0 : index
    %49 = vector.load %arg18[%c0_26, %c0_27] : memref<32x32xf32, #tpu.memory_space<vmem>>, vector<4x32xf32>
    tpu.vector_store %arg18[%c0_26, %c0_27], %46 {strides = array<i32>} : memref<32x32xf32, #tpu.memory_space<vmem>>, vector<4x32xf32>,
    %50 = vector.extract_strided_slice %15 {offsets = [4, 0], sizes = [4, 128], strides = [1, 1]} : vector<32x128xf32> to vector<4x128xf32>
    %c0_28 = arith.constant 0 : index
    %c0_29 = arith.constant 0 : index
    %51 = vector.load %arg16[%c0_28, %c0_29] : memref<4x32xf32, #tpu.memory_space<vmem>>, vector<4x32xf32>
    %c0_30 = arith.constant 0 : index
    %c0_31 = arith.constant 0 : index
    %52 = vector.load %arg6[%c0_30, %c0_31] : memref<32x128xf32, #tpu.memory_space<vmem>>, vector<32x128xf32>
    %cst_32 = arith.constant dense<0.000000e+00> : vector<4x128xf32>
    %53 = tpu.matmul %51, %52, %cst_32 {dimension_numbers = #tpu.dot_dimension_numbers<[1], [0], [0], [1], [0, 0, 1, 1], [], []>} : vector<4x32xf32>, vector<32x128xf32>, vector<4x128xf32> -> vector<4x128xf32>
    %54 = arith.addf %50, %53 : vector<4x128xf32>
    %55 = vector.extract_strided_slice %54 {offsets = [0, 0], sizes = [4, 32], strides = [1, 1]} : vector<4x128xf32> to vector<4x32xf32>
    %56 = arith.negf %55 : vector<4x32xf32>
    %57 = math.exp %56 : vector<4x32xf32>
    %cst_33 = arith.constant 1.000000e+00 : f32
    %58 = vector.broadcast %cst_33 : f32 to vector<4x32xf32>
    %59 = arith.addf %58, %57 : vector<4x32xf32>
    %60 = arith.divf %58, %59 : vector<4x32xf32>
    %61 = vector.extract_strided_slice %54 {offsets = [0, 32], sizes = [4, 32], strides = [1, 1]} : vector<4x128xf32> to vector<4x32xf32>
    %62 = arith.negf %61 : vector<4x32xf32>
    %63 = math.exp %62 : vector<4x32xf32>
    %cst_34 = arith.constant 1.000000e+00 : f32
    %64 = vector.broadcast %cst_34 : f32 to vector<4x32xf32>
    %65 = arith.addf %64, %63 : vector<4x32xf32>
    %66 = arith.divf %64, %65 : vector<4x32xf32>
    %67 = vector.extract_strided_slice %54 {offsets = [0, 64], sizes = [4, 32], strides = [1, 1]} : vector<4x128xf32> to vector<4x32xf32>
    %68 = math.tanh %67 : vector<4x32xf32>
    %69 = vector.extract_strided_slice %54 {offsets = [0, 96], sizes = [4, 32], strides = [1, 1]} : vector<4x128xf32> to vector<4x32xf32>
    %70 = arith.negf %69 : vector<4x32xf32>
    %71 = math.exp %70 : vector<4x32xf32>
    %cst_35 = arith.constant 1.000000e+00 : f32
    %72 = vector.broadcast %cst_35 : f32 to vector<4x32xf32>
    %73 = arith.addf %72, %71 : vector<4x32xf32>
    %74 = arith.divf %72, %73 : vector<4x32xf32>
    %c0_36 = arith.constant 0 : index
    %c0_37 = arith.constant 0 : index
    %75 = vector.load %arg17[%c0_36, %c0_37] : memref<4x32xf32, #tpu.memory_space<vmem>>, vector<4x32xf32>
    %76 = arith.mulf %66, %75 : vector<4x32xf32>
    %77 = arith.mulf %60, %68 : vector<4x32xf32>
    %78 = arith.addf %76, %77 : vector<4x32xf32>
    %79 = math.tanh %78 : vector<4x32xf32>
    %80 = arith.mulf %74, %79 : vector<4x32xf32>
    %c0_38 = arith.constant 0 : index
    %c0_39 = arith.constant 0 : index
    %81 = vector.load %arg17[%c0_38, %c0_39] : memref<4x32xf32, #tpu.memory_space<vmem>>, vector<4x32xf32>
    tpu.vector_store %arg17[%c0_38, %c0_39], %78 {strides = array<i32>} : memref<4x32xf32, #tpu.memory_space<vmem>>, vector<4x32xf32>,
    %c0_40 = arith.constant 0 : index
    %c0_41 = arith.constant 0 : index
    %82 = vector.load %arg16[%c0_40, %c0_41] : memref<4x32xf32, #tpu.memory_space<vmem>>, vector<4x32xf32>
    tpu.vector_store %arg16[%c0_40, %c0_41], %80 {strides = array<i32>} : memref<4x32xf32, #tpu.memory_space<vmem>>, vector<4x32xf32>,
    %c4 = arith.constant 4 : index
    %c0_42 = arith.constant 0 : index
    %83 = vector.load %arg18[%c4, %c0_42] : memref<32x32xf32, #tpu.memory_space<vmem>>, vector<4x32xf32>
    tpu.vector_store %arg18[%c4, %c0_42], %80 {strides = array<i32>} : memref<32x32xf32, #tpu.memory_space<vmem>>, vector<4x32xf32>,
    %84 = vector.extract_strided_slice %15 {offsets = [8, 0], sizes = [4, 128], strides = [1, 1]} : vector<32x128xf32> to vector<4x128xf32>
    %c0_43 = arith.constant 0 : index
    %c0_44 = arith.constant 0 : index
    %85 = vector.load %arg16[%c0_43, %c0_44] : memref<4x32xf32, #tpu.memory_space<vmem>>, vector<4x32xf32>
    %c0_45 = arith.constant 0 : index
    %c0_46 = arith.constant 0 : index
    %86 = vector.load %arg6[%c0_45, %c0_46] : memref<32x128xf32, #tpu.memory_space<vmem>>, vector<32x128xf32>
    %cst_47 = arith.constant dense<0.000000e+00> : vector<4x128xf32>
    %87 = tpu.matmul %85, %86, %cst_47 {dimension_numbers = #tpu.dot_dimension_numbers<[1], [0], [0], [1], [0, 0, 1, 1], [], []>} : vector<4x32xf32>, vector<32x128xf32>, vector<4x128xf32> -> vector<4x128xf32>
    %88 = arith.addf %84, %87 : vector<4x128xf32>
    %89 = vector.extract_strided_slice %88 {offsets = [0, 0], sizes = [4, 32], strides = [1, 1]} : vector<4x128xf32> to vector<4x32xf32>
    %90 = arith.negf %89 : vector<4x32xf32>
    %91 = math.exp %90 : vector<4x32xf32>
    %cst_48 = arith.constant 1.000000e+00 : f32
    %92 = vector.broadcast %cst_48 : f32 to vector<4x32xf32>
    %93 = arith.addf %92, %91 : vector<4x32xf32>
    %94 = arith.divf %92, %93 : vector<4x32xf32>
    %95 = vector.extract_strided_slice %88 {offsets = [0, 32], sizes = [4, 32], strides = [1, 1]} : vector<4x128xf32> to vector<4x32xf32>
    %96 = arith.negf %95 : vector<4x32xf32>
    %97 = math.exp %96 : vector<4x32xf32>
    %cst_49 = arith.constant 1.000000e+00 : f32
    %98 = vector.broadcast %cst_49 : f32 to vector<4x32xf32>
    %99 = arith.addf %98, %97 : vector<4x32xf32>
    %100 = arith.divf %98, %99 : vector<4x32xf32>
    %101 = vector.extract_strided_slice %88 {offsets = [0, 64], sizes = [4, 32], strides = [1, 1]} : vector<4x128xf32> to vector<4x32xf32>
    %102 = math.tanh %101 : vector<4x32xf32>
    %103 = vector.extract_strided_slice %88 {offsets = [0, 96], sizes = [4, 32], strides = [1, 1]} : vector<4x128xf32> to vector<4x32xf32>
    %104 = arith.negf %103 : vector<4x32xf32>
    %105 = math.exp %104 : vector<4x32xf32>
    %cst_50 = arith.constant 1.000000e+00 : f32
    %106 = vector.broadcast %cst_50 : f32 to vector<4x32xf32>
    %107 = arith.addf %106, %105 : vector<4x32xf32>
    %108 = arith.divf %106, %107 : vector<4x32xf32>
    %c0_51 = arith.constant 0 : index
    %c0_52 = arith.constant 0 : index
    %109 = vector.load %arg17[%c0_51, %c0_52] : memref<4x32xf32, #tpu.memory_space<vmem>>, vector<4x32xf32>
    %110 = arith.mulf %100, %109 : vector<4x32xf32>
    %111 = arith.mulf %94, %102 : vector<4x32xf32>
    %112 = arith.addf %110, %111 : vector<4x32xf32>
    %113 = math.tanh %112 : vector<4x32xf32>
    %114 = arith.mulf %108, %113 : vector<4x32xf32>
    %c0_53 = arith.constant 0 : index
    %c0_54 = arith.constant 0 : index
    %115 = vector.load %arg17[%c0_53, %c0_54] : memref<4x32xf32, #tpu.memory_space<vmem>>, vector<4x32xf32>
    tpu.vector_store %arg17[%c0_53, %c0_54], %112 {strides = array<i32>} : memref<4x32xf32, #tpu.memory_space<vmem>>, vector<4x32xf32>,
    %c0_55 = arith.constant 0 : index
    %c0_56 = arith.constant 0 : index
    %116 = vector.load %arg16[%c0_55, %c0_56] : memref<4x32xf32, #tpu.memory_space<vmem>>, vector<4x32xf32>
    tpu.vector_store %arg16[%c0_55, %c0_56], %114 {strides = array<i32>} : memref<4x32xf32, #tpu.memory_space<vmem>>, vector<4x32xf32>,
    %c8 = arith.constant 8 : index
    %c0_57 = arith.constant 0 : index
    %117 = vector.load %arg18[%c8, %c0_57] : memref<32x32xf32, #tpu.memory_space<vmem>>, vector<4x32xf32>
    tpu.vector_store %arg18[%c8, %c0_57], %114 {strides = array<i32>} : memref<32x32xf32, #tpu.memory_space<vmem>>, vector<4x32xf32>,
    %118 = vector.extract_strided_slice %15 {offsets = [12, 0], sizes = [4, 128], strides = [1, 1]} : vector<32x128xf32> to vector<4x128xf32>
    %c0_58 = arith.constant 0 : index
    %c0_59 = arith.constant 0 : index
    %119 = vector.load %arg16[%c0_58, %c0_59] : memref<4x32xf32, #tpu.memory_space<vmem>>, vector<4x32xf32>
    %c0_60 = arith.constant 0 : index
    %c0_61 = arith.constant 0 : index
    %120 = vector.load %arg6[%c0_60, %c0_61] : memref<32x128xf32, #tpu.memory_space<vmem>>, vector<32x128xf32>
    %cst_62 = arith.constant dense<0.000000e+00> : vector<4x128xf32>
    %121 = tpu.matmul %119, %120, %cst_62 {dimension_numbers = #tpu.dot_dimension_numbers<[1], [0], [0], [1], [0, 0, 1, 1], [], []>} : vector<4x32xf32>, vector<32x128xf32>, vector<4x128xf32> -> vector<4x128xf32>
    %122 = arith.addf %118, %121 : vector<4x128xf32>
    %123 = vector.extract_strided_slice %122 {offsets = [0, 0], sizes = [4, 32], strides = [1, 1]} : vector<4x128xf32> to vector<4x32xf32>
    %124 = arith.negf %123 : vector<4x32xf32>
    %125 = math.exp %124 : vector<4x32xf32>
    %cst_63 = arith.constant 1.000000e+00 : f32
    %126 = vector.broadcast %cst_63 : f32 to vector<4x32xf32>
    %127 = arith.addf %126, %125 : vector<4x32xf32>
    %128 = arith.divf %126, %127 : vector<4x32xf32>
    %129 = vector.extract_strided_slice %122 {offsets = [0, 32], sizes = [4, 32], strides = [1, 1]} : vector<4x128xf32> to vector<4x32xf32>
    %130 = arith.negf %129 : vector<4x32xf32>
    %131 = math.exp %130 : vector<4x32xf32>
    %cst_64 = arith.constant 1.000000e+00 : f32
    %132 = vector.broadcast %cst_64 : f32 to vector<4x32xf32>
    %133 = arith.addf %132, %131 : vector<4x32xf32>
    %134 = arith.divf %132, %133 : vector<4x32xf32>
    %135 = vector.extract_strided_slice %122 {offsets = [0, 64], sizes = [4, 32], strides = [1, 1]} : vector<4x128xf32> to vector<4x32xf32>
    %136 = math.tanh %135 : vector<4x32xf32>
    %137 = vector.extract_strided_slice %122 {offsets = [0, 96], sizes = [4, 32], strides = [1, 1]} : vector<4x128xf32> to vector<4x32xf32>
    %138 = arith.negf %137 : vector<4x32xf32>
    %139 = math.exp %138 : vector<4x32xf32>
    %cst_65 = arith.constant 1.000000e+00 : f32
    %140 = vector.broadcast %cst_65 : f32 to vector<4x32xf32>
    %141 = arith.addf %140, %139 : vector<4x32xf32>
    %142 = arith.divf %140, %141 : vector<4x32xf32>
    %c0_66 = arith.constant 0 : index
    %c0_67 = arith.constant 0 : index
    %143 = vector.load %arg17[%c0_66, %c0_67] : memref<4x32xf32, #tpu.memory_space<vmem>>, vector<4x32xf32>
    %144 = arith.mulf %134, %143 : vector<4x32xf32>
    %145 = arith.mulf %128, %136 : vector<4x32xf32>
    %146 = arith.addf %144, %145 : vector<4x32xf32>
    %147 = math.tanh %146 : vector<4x32xf32>
    %148 = arith.mulf %142, %147 : vector<4x32xf32>
    %c0_68 = arith.constant 0 : index
    %c0_69 = arith.constant 0 : index
    %149 = vector.load %arg17[%c0_68, %c0_69] : memref<4x32xf32, #tpu.memory_space<vmem>>, vector<4x32xf32>
    tpu.vector_store %arg17[%c0_68, %c0_69], %146 {strides = array<i32>} : memref<4x32xf32, #tpu.memory_space<vmem>>, vector<4x32xf32>,
    %c0_70 = arith.constant 0 : index
    %c0_71 = arith.constant 0 : index
    %150 = vector.load %arg16[%c0_70, %c0_71] : memref<4x32xf32, #tpu.memory_space<vmem>>, vector<4x32xf32>
    tpu.vector_store %arg16[%c0_70, %c0_71], %148 {strides = array<i32>} : memref<4x32xf32, #tpu.memory_space<vmem>>, vector<4x32xf32>,
    %c12 = arith.constant 12 : index
    %c0_72 = arith.constant 0 : index
    %151 = vector.load %arg18[%c12, %c0_72] : memref<32x32xf32, #tpu.memory_space<vmem>>, vector<4x32xf32>
    tpu.vector_store %arg18[%c12, %c0_72], %148 {strides = array<i32>} : memref<32x32xf32, #tpu.memory_space<vmem>>, vector<4x32xf32>,
    %152 = vector.extract_strided_slice %15 {offsets = [16, 0], sizes = [4, 128], strides = [1, 1]} : vector<32x128xf32> to vector<4x128xf32>
    %c0_73 = arith.constant 0 : index
    %c0_74 = arith.constant 0 : index
    %153 = vector.load %arg16[%c0_73, %c0_74] : memref<4x32xf32, #tpu.memory_space<vmem>>, vector<4x32xf32>
    %c0_75 = arith.constant 0 : index
    %c0_76 = arith.constant 0 : index
    %154 = vector.load %arg6[%c0_75, %c0_76] : memref<32x128xf32, #tpu.memory_space<vmem>>, vector<32x128xf32>
    %cst_77 = arith.constant dense<0.000000e+00> : vector<4x128xf32>
    %155 = tpu.matmul %153, %154, %cst_77 {dimension_numbers = #tpu.dot_dimension_numbers<[1], [0], [0], [1], [0, 0, 1, 1], [], []>} : vector<4x32xf32>, vector<32x128xf32>, vector<4x128xf32> -> vector<4x128xf32>
    %156 = arith.addf %152, %155 : vector<4x128xf32>
    %157 = vector.extract_strided_slice %156 {offsets = [0, 0], sizes = [4, 32], strides = [1, 1]} : vector<4x128xf32> to vector<4x32xf32>
    %158 = arith.negf %157 : vector<4x32xf32>
    %159 = math.exp %158 : vector<4x32xf32>
    %cst_78 = arith.constant 1.000000e+00 : f32
    %160 = vector.broadcast %cst_78 : f32 to vector<4x32xf32>
    %161 = arith.addf %160, %159 : vector<4x32xf32>
    %162 = arith.divf %160, %161 : vector<4x32xf32>
    %163 = vector.extract_strided_slice %156 {offsets = [0, 32], sizes = [4, 32], strides = [1, 1]} : vector<4x128xf32> to vector<4x32xf32>
    %164 = arith.negf %163 : vector<4x32xf32>
    %165 = math.exp %164 : vector<4x32xf32>
    %cst_79 = arith.constant 1.000000e+00 : f32
    %166 = vector.broadcast %cst_79 : f32 to vector<4x32xf32>
    %167 = arith.addf %166, %165 : vector<4x32xf32>
    %168 = arith.divf %166, %167 : vector<4x32xf32>
    %169 = vector.extract_strided_slice %156 {offsets = [0, 64], sizes = [4, 32], strides = [1, 1]} : vector<4x128xf32> to vector<4x32xf32>
    %170 = math.tanh %169 : vector<4x32xf32>
    %171 = vector.extract_strided_slice %156 {offsets = [0, 96], sizes = [4, 32], strides = [1, 1]} : vector<4x128xf32> to vector<4x32xf32>
    %172 = arith.negf %171 : vector<4x32xf32>
    %173 = math.exp %172 : vector<4x32xf32>
    %cst_80 = arith.constant 1.000000e+00 : f32
    %174 = vector.broadcast %cst_80 : f32 to vector<4x32xf32>
    %175 = arith.addf %174, %173 : vector<4x32xf32>
    %176 = arith.divf %174, %175 : vector<4x32xf32>
    %c0_81 = arith.constant 0 : index
    %c0_82 = arith.constant 0 : index
    %177 = vector.load %arg17[%c0_81, %c0_82] : memref<4x32xf32, #tpu.memory_space<vmem>>, vector<4x32xf32>
    %178 = arith.mulf %168, %177 : vector<4x32xf32>
    %179 = arith.mulf %162, %170 : vector<4x32xf32>
    %180 = arith.addf %178, %179 : vector<4x32xf32>
    %181 = math.tanh %180 : vector<4x32xf32>
    %182 = arith.mulf %176, %181 : vector<4x32xf32>
    %c0_83 = arith.constant 0 : index
    %c0_84 = arith.constant 0 : index
    %183 = vector.load %arg17[%c0_83, %c0_84] : memref<4x32xf32, #tpu.memory_space<vmem>>, vector<4x32xf32>
    tpu.vector_store %arg17[%c0_83, %c0_84], %180 {strides = array<i32>} : memref<4x32xf32, #tpu.memory_space<vmem>>, vector<4x32xf32>,
    %c0_85 = arith.constant 0 : index
    %c0_86 = arith.constant 0 : index
    %184 = vector.load %arg16[%c0_85, %c0_86] : memref<4x32xf32, #tpu.memory_space<vmem>>, vector<4x32xf32>
    tpu.vector_store %arg16[%c0_85, %c0_86], %182 {strides = array<i32>} : memref<4x32xf32, #tpu.memory_space<vmem>>, vector<4x32xf32>,
    %c16 = arith.constant 16 : index
    %c0_87 = arith.constant 0 : index
    %185 = vector.load %arg18[%c16, %c0_87] : memref<32x32xf32, #tpu.memory_space<vmem>>, vector<4x32xf32>
    tpu.vector_store %arg18[%c16, %c0_87], %182 {strides = array<i32>} : memref<32x32xf32, #tpu.memory_space<vmem>>, vector<4x32xf32>,
    %186 = vector.extract_strided_slice %15 {offsets = [20, 0], sizes = [4, 128], strides = [1, 1]} : vector<32x128xf32> to vector<4x128xf32>
    %c0_88 = arith.constant 0 : index
    %c0_89 = arith.constant 0 : index
    %187 = vector.load %arg16[%c0_88, %c0_89] : memref<4x32xf32, #tpu.memory_space<vmem>>, vector<4x32xf32>
    %c0_90 = arith.constant 0 : index
    %c0_91 = arith.constant 0 : index
    %188 = vector.load %arg6[%c0_90, %c0_91] : memref<32x128xf32, #tpu.memory_space<vmem>>, vector<32x128xf32>
    %cst_92 = arith.constant dense<0.000000e+00> : vector<4x128xf32>
    %189 = tpu.matmul %187, %188, %cst_92 {dimension_numbers = #tpu.dot_dimension_numbers<[1], [0], [0], [1], [0, 0, 1, 1], [], []>} : vector<4x32xf32>, vector<32x128xf32>, vector<4x128xf32> -> vector<4x128xf32>
    %190 = arith.addf %186, %189 : vector<4x128xf32>
    %191 = vector.extract_strided_slice %190 {offsets = [0, 0], sizes = [4, 32], strides = [1, 1]} : vector<4x128xf32> to vector<4x32xf32>
    %192 = arith.negf %191 : vector<4x32xf32>
    %193 = math.exp %192 : vector<4x32xf32>
    %cst_93 = arith.constant 1.000000e+00 : f32
    %194 = vector.broadcast %cst_93 : f32 to vector<4x32xf32>
    %195 = arith.addf %194, %193 : vector<4x32xf32>
    %196 = arith.divf %194, %195 : vector<4x32xf32>
    %197 = vector.extract_strided_slice %190 {offsets = [0, 32], sizes = [4, 32], strides = [1, 1]} : vector<4x128xf32> to vector<4x32xf32>
    %198 = arith.negf %197 : vector<4x32xf32>
    %199 = math.exp %198 : vector<4x32xf32>
    %cst_94 = arith.constant 1.000000e+00 : f32
    %200 = vector.broadcast %cst_94 : f32 to vector<4x32xf32>
    %201 = arith.addf %200, %199 : vector<4x32xf32>
    %202 = arith.divf %200, %201 : vector<4x32xf32>
    %203 = vector.extract_strided_slice %190 {offsets = [0, 64], sizes = [4, 32], strides = [1, 1]} : vector<4x128xf32> to vector<4x32xf32>
    %204 = math.tanh %203 : vector<4x32xf32>
    %205 = vector.extract_strided_slice %190 {offsets = [0, 96], sizes = [4, 32], strides = [1, 1]} : vector<4x128xf32> to vector<4x32xf32>
    %206 = arith.negf %205 : vector<4x32xf32>
    %207 = math.exp %206 : vector<4x32xf32>
    %cst_95 = arith.constant 1.000000e+00 : f32
    %208 = vector.broadcast %cst_95 : f32 to vector<4x32xf32>
    %209 = arith.addf %208, %207 : vector<4x32xf32>
    %210 = arith.divf %208, %209 : vector<4x32xf32>
    %c0_96 = arith.constant 0 : index
    %c0_97 = arith.constant 0 : index
    %211 = vector.load %arg17[%c0_96, %c0_97] : memref<4x32xf32, #tpu.memory_space<vmem>>, vector<4x32xf32>
    %212 = arith.mulf %202, %211 : vector<4x32xf32>
    %213 = arith.mulf %196, %204 : vector<4x32xf32>
    %214 = arith.addf %212, %213 : vector<4x32xf32>
    %215 = math.tanh %214 : vector<4x32xf32>
    %216 = arith.mulf %210, %215 : vector<4x32xf32>
    %c0_98 = arith.constant 0 : index
    %c0_99 = arith.constant 0 : index
    %217 = vector.load %arg17[%c0_98, %c0_99] : memref<4x32xf32, #tpu.memory_space<vmem>>, vector<4x32xf32>
    tpu.vector_store %arg17[%c0_98, %c0_99], %214 {strides = array<i32>} : memref<4x32xf32, #tpu.memory_space<vmem>>, vector<4x32xf32>,
    %c0_100 = arith.constant 0 : index
    %c0_101 = arith.constant 0 : index
    %218 = vector.load %arg16[%c0_100, %c0_101] : memref<4x32xf32, #tpu.memory_space<vmem>>, vector<4x32xf32>
    tpu.vector_store %arg16[%c0_100, %c0_101], %216 {strides = array<i32>} : memref<4x32xf32, #tpu.memory_space<vmem>>, vector<4x32xf32>,
    %c20 = arith.constant 20 : index
    %c0_102 = arith.constant 0 : index
    %219 = vector.load %arg18[%c20, %c0_102] : memref<32x32xf32, #tpu.memory_space<vmem>>, vector<4x32xf32>
    tpu.vector_store %arg18[%c20, %c0_102], %216 {strides = array<i32>} : memref<32x32xf32, #tpu.memory_space<vmem>>, vector<4x32xf32>,
    %220 = vector.extract_strided_slice %15 {offsets = [24, 0], sizes = [4, 128], strides = [1, 1]} : vector<32x128xf32> to vector<4x128xf32>
    %c0_103 = arith.constant 0 : index
    %c0_104 = arith.constant 0 : index
    %221 = vector.load %arg16[%c0_103, %c0_104] : memref<4x32xf32, #tpu.memory_space<vmem>>, vector<4x32xf32>
    %c0_105 = arith.constant 0 : index
    %c0_106 = arith.constant 0 : index
    %222 = vector.load %arg6[%c0_105, %c0_106] : memref<32x128xf32, #tpu.memory_space<vmem>>, vector<32x128xf32>
    %cst_107 = arith.constant dense<0.000000e+00> : vector<4x128xf32>
    %223 = tpu.matmul %221, %222, %cst_107 {dimension_numbers = #tpu.dot_dimension_numbers<[1], [0], [0], [1], [0, 0, 1, 1], [], []>} : vector<4x32xf32>, vector<32x128xf32>, vector<4x128xf32> -> vector<4x128xf32>
    %224 = arith.addf %220, %223 : vector<4x128xf32>
    %225 = vector.extract_strided_slice %224 {offsets = [0, 0], sizes = [4, 32], strides = [1, 1]} : vector<4x128xf32> to vector<4x32xf32>
    %226 = arith.negf %225 : vector<4x32xf32>
    %227 = math.exp %226 : vector<4x32xf32>
    %cst_108 = arith.constant 1.000000e+00 : f32
    %228 = vector.broadcast %cst_108 : f32 to vector<4x32xf32>
    %229 = arith.addf %228, %227 : vector<4x32xf32>
    %230 = arith.divf %228, %229 : vector<4x32xf32>
    %231 = vector.extract_strided_slice %224 {offsets = [0, 32], sizes = [4, 32], strides = [1, 1]} : vector<4x128xf32> to vector<4x32xf32>
    %232 = arith.negf %231 : vector<4x32xf32>
    %233 = math.exp %232 : vector<4x32xf32>
    %cst_109 = arith.constant 1.000000e+00 : f32
    %234 = vector.broadcast %cst_109 : f32 to vector<4x32xf32>
    %235 = arith.addf %234, %233 : vector<4x32xf32>
    %236 = arith.divf %234, %235 : vector<4x32xf32>
    %237 = vector.extract_strided_slice %224 {offsets = [0, 64], sizes = [4, 32], strides = [1, 1]} : vector<4x128xf32> to vector<4x32xf32>
    %238 = math.tanh %237 : vector<4x32xf32>
    %239 = vector.extract_strided_slice %224 {offsets = [0, 96], sizes = [4, 32], strides = [1, 1]} : vector<4x128xf32> to vector<4x32xf32>
    %240 = arith.negf %239 : vector<4x32xf32>
    %241 = math.exp %240 : vector<4x32xf32>
    %cst_110 = arith.constant 1.000000e+00 : f32
    %242 = vector.broadcast %cst_110 : f32 to vector<4x32xf32>
    %243 = arith.addf %242, %241 : vector<4x32xf32>
    %244 = arith.divf %242, %243 : vector<4x32xf32>
    %c0_111 = arith.constant 0 : index
    %c0_112 = arith.constant 0 : index
    %245 = vector.load %arg17[%c0_111, %c0_112] : memref<4x32xf32, #tpu.memory_space<vmem>>, vector<4x32xf32>
    %246 = arith.mulf %236, %245 : vector<4x32xf32>
    %247 = arith.mulf %230, %238 : vector<4x32xf32>
    %248 = arith.addf %246, %247 : vector<4x32xf32>
    %249 = math.tanh %248 : vector<4x32xf32>
    %250 = arith.mulf %244, %249 : vector<4x32xf32>
    %c0_113 = arith.constant 0 : index
    %c0_114 = arith.constant 0 : index
    %251 = vector.load %arg17[%c0_113, %c0_114] : memref<4x32xf32, #tpu.memory_space<vmem>>, vector<4x32xf32>
    tpu.vector_store %arg17[%c0_113, %c0_114], %248 {strides = array<i32>} : memref<4x32xf32, #tpu.memory_space<vmem>>, vector<4x32xf32>,
    %c0_115 = arith.constant 0 : index
    %c0_116 = arith.constant 0 : index
    %252 = vector.load %arg16[%c0_115, %c0_116] : memref<4x32xf32, #tpu.memory_space<vmem>>, vector<4x32xf32>
    tpu.vector_store %arg16[%c0_115, %c0_116], %250 {strides = array<i32>} : memref<4x32xf32, #tpu.memory_space<vmem>>, vector<4x32xf32>,
    %c24 = arith.constant 24 : index
    %c0_117 = arith.constant 0 : index
    %253 = vector.load %arg18[%c24, %c0_117] : memref<32x32xf32, #tpu.memory_space<vmem>>, vector<4x32xf32>
    tpu.vector_store %arg18[%c24, %c0_117], %250 {strides = array<i32>} : memref<32x32xf32, #tpu.memory_space<vmem>>, vector<4x32xf32>,
    %254 = vector.extract_strided_slice %15 {offsets = [28, 0], sizes = [4, 128], strides = [1, 1]} : vector<32x128xf32> to vector<4x128xf32>
    %c0_118 = arith.constant 0 : index
    %c0_119 = arith.constant 0 : index
    %255 = vector.load %arg16[%c0_118, %c0_119] : memref<4x32xf32, #tpu.memory_space<vmem>>, vector<4x32xf32>
    %c0_120 = arith.constant 0 : index
    %c0_121 = arith.constant 0 : index
    %256 = vector.load %arg6[%c0_120, %c0_121] : memref<32x128xf32, #tpu.memory_space<vmem>>, vector<32x128xf32>
    %cst_122 = arith.constant dense<0.000000e+00> : vector<4x128xf32>
    %257 = tpu.matmul %255, %256, %cst_122 {dimension_numbers = #tpu.dot_dimension_numbers<[1], [0], [0], [1], [0, 0, 1, 1], [], []>} : vector<4x32xf32>, vector<32x128xf32>, vector<4x128xf32> -> vector<4x128xf32>
    %258 = arith.addf %254, %257 : vector<4x128xf32>
    %259 = vector.extract_strided_slice %258 {offsets = [0, 0], sizes = [4, 32], strides = [1, 1]} : vector<4x128xf32> to vector<4x32xf32>
    %260 = arith.negf %259 : vector<4x32xf32>
    %261 = math.exp %260 : vector<4x32xf32>
    %cst_123 = arith.constant 1.000000e+00 : f32
    %262 = vector.broadcast %cst_123 : f32 to vector<4x32xf32>
    %263 = arith.addf %262, %261 : vector<4x32xf32>
    %264 = arith.divf %262, %263 : vector<4x32xf32>
    %265 = vector.extract_strided_slice %258 {offsets = [0, 32], sizes = [4, 32], strides = [1, 1]} : vector<4x128xf32> to vector<4x32xf32>
    %266 = arith.negf %265 : vector<4x32xf32>
    %267 = math.exp %266 : vector<4x32xf32>
    %cst_124 = arith.constant 1.000000e+00 : f32
    %268 = vector.broadcast %cst_124 : f32 to vector<4x32xf32>
    %269 = arith.addf %268, %267 : vector<4x32xf32>
    %270 = arith.divf %268, %269 : vector<4x32xf32>
    %271 = vector.extract_strided_slice %258 {offsets = [0, 64], sizes = [4, 32], strides = [1, 1]} : vector<4x128xf32> to vector<4x32xf32>
    %272 = math.tanh %271 : vector<4x32xf32>
    %273 = vector.extract_strided_slice %258 {offsets = [0, 96], sizes = [4, 32], strides = [1, 1]} : vector<4x128xf32> to vector<4x32xf32>
    %274 = arith.negf %273 : vector<4x32xf32>
    %275 = math.exp %274 : vector<4x32xf32>
    %cst_125 = arith.constant 1.000000e+00 : f32
    %276 = vector.broadcast %cst_125 : f32 to vector<4x32xf32>
    %277 = arith.addf %276, %275 : vector<4x32xf32>
    %278 = arith.divf %276, %277 : vector<4x32xf32>
    %c0_126 = arith.constant 0 : index
    %c0_127 = arith.constant 0 : index
    %279 = vector.load %arg17[%c0_126, %c0_127] : memref<4x32xf32, #tpu.memory_space<vmem>>, vector<4x32xf32>
    %280 = arith.mulf %270, %279 : vector<4x32xf32>
    %281 = arith.mulf %264, %272 : vector<4x32xf32>
    %282 = arith.addf %280, %281 : vector<4x32xf32>
    %283 = math.tanh %282 : vector<4x32xf32>
    %284 = arith.mulf %278, %283 : vector<4x32xf32>
    %c0_128 = arith.constant 0 : index
    %c0_129 = arith.constant 0 : index
    %285 = vector.load %arg17[%c0_128, %c0_129] : memref<4x32xf32, #tpu.memory_space<vmem>>, vector<4x32xf32>
    tpu.vector_store %arg17[%c0_128, %c0_129], %282 {strides = array<i32>} : memref<4x32xf32, #tpu.memory_space<vmem>>, vector<4x32xf32>,
    %c0_130 = arith.constant 0 : index
    %c0_131 = arith.constant 0 : index
    %286 = vector.load %arg16[%c0_130, %c0_131] : memref<4x32xf32, #tpu.memory_space<vmem>>, vector<4x32xf32>
    tpu.vector_store %arg16[%c0_130, %c0_131], %284 {strides = array<i32>} : memref<4x32xf32, #tpu.memory_space<vmem>>, vector<4x32xf32>,
    %c28 = arith.constant 28 : index
    %c0_132 = arith.constant 0 : index
    %287 = vector.load %arg18[%c28, %c0_132] : memref<32x32xf32, #tpu.memory_space<vmem>>, vector<4x32xf32>
    tpu.vector_store %arg18[%c28, %c0_132], %284 {strides = array<i32>} : memref<32x32xf32, #tpu.memory_space<vmem>>, vector<4x32xf32>,
    %c0_133 = arith.constant 0 : index
    %c0_134 = arith.constant 0 : index
    %288 = vector.load %arg18[%c0_133, %c0_134] : memref<32x32xf32, #tpu.memory_space<vmem>>, vector<32x32xf32>
    %c0_135 = arith.constant 0 : index
    %c0_136 = arith.constant 0 : index
    %289 = vector.load %arg7[%c0_135, %c0_136] : memref<32x384xf32, #tpu.memory_space<vmem>>, vector<32x384xf32>
    %cst_137 = arith.constant dense<0.000000e+00> : vector<32x384xf32>
    %290 = tpu.matmul %288, %289, %cst_137 {dimension_numbers = #tpu.dot_dimension_numbers<[1], [0], [0], [1], [0, 0, 1, 1], [], []>} : vector<32x32xf32>, vector<32x384xf32>, vector<32x384xf32> -> vector<32x384xf32>
    %c0_138 = arith.constant 0 : index
    %c0_139 = arith.constant 0 : index
    %291 = vector.load %arg8[%c0_138, %c0_139] : memref<1x384xf32, #tpu.memory_space<vmem>>, vector<1x384xf32>
    %292 = vector.broadcast %291 : vector<1x384xf32> to vector<32x384xf32>
    %293 = arith.addf %290, %292 : vector<32x384xf32>
    %cst_140 = arith.constant 0.000000e+00 : f32
    %294 = vector.broadcast %cst_140 : f32 to vector<32x384xf32>
    %295 = arith.maximumf %293, %294 : vector<32x384xf32>
    %c0_141 = arith.constant 0 : index
    %c0_142 = arith.constant 0 : index
    %296 = vector.load %arg9[%c0_141, %c0_142] : memref<384x192xf32, #tpu.memory_space<vmem>>, vector<384x192xf32>
    %cst_143 = arith.constant dense<0.000000e+00> : vector<32x192xf32>
    %297 = tpu.matmul %295, %296, %cst_143 {dimension_numbers = #tpu.dot_dimension_numbers<[1], [0], [0], [1], [0, 0, 1, 1], [], []>} : vector<32x384xf32>, vector<384x192xf32>, vector<32x192xf32> -> vector<32x192xf32>
    %c0_144 = arith.constant 0 : index
    %c0_145 = arith.constant 0 : index
    %298 = vector.load %arg10[%c0_144, %c0_145] : memref<1x192xf32, #tpu.memory_space<vmem>>, vector<1x192xf32>
    %299 = vector.broadcast %298 : vector<1x192xf32> to vector<32x192xf32>
    %300 = arith.addf %297, %299 : vector<32x192xf32>
    %cst_146 = arith.constant 0.000000e+00 : f32
    %301 = vector.broadcast %cst_146 : f32 to vector<32x192xf32>
    %302 = arith.maximumf %300, %301 : vector<32x192xf32>
    %c0_147 = arith.constant 0 : index
    %c0_148 = arith.constant 0 : index
    %303 = vector.load %arg11[%c0_147, %c0_148] : memref<192x3xf32, #tpu.memory_space<vmem>>, vector<192x3xf32>
    %cst_149 = arith.constant dense<0.000000e+00> : vector<32x3xf32>
    %304 = tpu.matmul %302, %303, %cst_149 {dimension_numbers = #tpu.dot_dimension_numbers<[1], [0], [0], [1], [0, 0, 1, 1], [], []>} : vector<32x192xf32>, vector<192x3xf32>, vector<32x3xf32> -> vector<32x3xf32>
    %c0_150 = arith.constant 0 : index
    %c0_151 = arith.constant 0 : index
    %305 = vector.load %arg12[%c0_150, %c0_151] : memref<1x3xf32, #tpu.memory_space<vmem>>, vector<1x3xf32>
    %306 = vector.broadcast %305 : vector<1x3xf32> to vector<32x3xf32>
    %307 = arith.addf %304, %306 : vector<32x3xf32>
    %c0_152 = arith.constant 0 : index
    %c0_153 = arith.constant 0 : index
    %308 = vector.load %arg13[%c0_152, %c0_153] : memref<32x3xf32, #tpu.memory_space<vmem>>, vector<32x3xf32>
    tpu.vector_store %arg13[%c0_152, %c0_153], %307 {strides = array<i32>} : memref<32x3xf32, #tpu.memory_space<vmem>>, vector<32x3xf32>,
    %c0_i32_154 = arith.constant 0 : i32
    %309 = arith.cmpi eq, %arg0, %c0_i32_154 : i32
    %310 = arith.extui %309 : i1 to i32
    %c0_i32_155 = arith.constant 0 : i32
    %311 = arith.cmpi ne, %310, %c0_i32_155 : i32
    scf.if %311 {
      %c0_156 = arith.constant 0 : index
      %c0_157 = arith.constant 0 : index
      %312 = vector.load %arg16[%c0_156, %c0_157] : memref<4x32xf32, #tpu.memory_space<vmem>>, vector<4x32xf32>
      %c0_158 = arith.constant 0 : index
      %c0_159 = arith.constant 0 : index
      %c0_160 = arith.constant 0 : index
      %313 = vector.load %arg14[%c0_158, %c0_159, %c0_160] : memref<1x4x32xf32, #tpu.memory_space<vmem>>, vector<1x4x32xf32>
      %314 = vector.shape_cast %313 : vector<1x4x32xf32> to vector<4x32xf32>
      %315 = vector.shape_cast %312 : vector<4x32xf32> to vector<1x4x32xf32>
      tpu.vector_store %arg14[%c0_158, %c0_159, %c0_160], %315 {strides = array<i32>} : memref<1x4x32xf32, #tpu.memory_space<vmem>>, vector<1x4x32xf32>,
      %c0_161 = arith.constant 0 : index
      %c0_162 = arith.constant 0 : index
      %316 = vector.load %arg17[%c0_161, %c0_162] : memref<4x32xf32, #tpu.memory_space<vmem>>, vector<4x32xf32>
      %c0_163 = arith.constant 0 : index
      %c0_164 = arith.constant 0 : index
      %c0_165 = arith.constant 0 : index
      %317 = vector.load %arg15[%c0_163, %c0_164, %c0_165] : memref<1x4x32xf32, #tpu.memory_space<vmem>>, vector<1x4x32xf32>
      %318 = vector.shape_cast %317 : vector<1x4x32xf32> to vector<4x32xf32>
      %319 = vector.shape_cast %316 : vector<4x32xf32> to vector<1x4x32xf32>
      tpu.vector_store %arg15[%c0_163, %c0_164, %c0_165], %319 {strides = array<i32>} : memref<1x4x32xf32, #tpu.memory_space<vmem>>, vector<1x4x32xf32>,
    } else {
    }
    return
  }
  func.func @transform_0(%arg0: i32) -> (i32, i32) {
    %c0_i32 = arith.constant 0 : i32
    %c0_i32_0 = arith.constant 0 : i32
    return %arg0, %c0_i32 : i32, i32
  }
  func.func @transform_1(%arg0: i32) -> (i32, i32) {
    %c0_i32 = arith.constant 0 : i32
    %c0_i32_0 = arith.constant 0 : i32
    %c0_i32_1 = arith.constant 0 : i32
    return %c0_i32, %c0_i32_0 : i32, i32
  }
  func.func @transform_2(%arg0: i32) -> (i32, i32) {
    %c0_i32 = arith.constant 0 : i32
    %c0_i32_0 = arith.constant 0 : i32
    %c0_i32_1 = arith.constant 0 : i32
    return %c0_i32, %c0_i32_0 : i32, i32
  }
  func.func @transform_3(%arg0: i32) -> (i32, i32) {
    %c0_i32 = arith.constant 0 : i32
    %c0_i32_0 = arith.constant 0 : i32
    %c0_i32_1 = arith.constant 0 : i32
    return %c0_i32, %c0_i32_0 : i32, i32
  }
  func.func @transform_4(%arg0: i32) -> (i32, i32) {
    %c0_i32 = arith.constant 0 : i32
    %c0_i32_0 = arith.constant 0 : i32
    %c0_i32_1 = arith.constant 0 : i32
    return %c0_i32, %c0_i32_0 : i32, i32
  }
  func.func @transform_5(%arg0: i32) -> (i32, i32) {
    %c0_i32 = arith.constant 0 : i32
    %c0_i32_0 = arith.constant 0 : i32
    %c0_i32_1 = arith.constant 0 : i32
    return %c0_i32, %c0_i32_0 : i32, i32
  }
  func.func @transform_6(%arg0: i32) -> (i32, i32) {
    %c0_i32 = arith.constant 0 : i32
    %c0_i32_0 = arith.constant 0 : i32
    %c0_i32_1 = arith.constant 0 : i32
    return %c0_i32, %c0_i32_0 : i32, i32
  }
  func.func @transform_7(%arg0: i32) -> (i32, i32) {
    %c0_i32 = arith.constant 0 : i32
    %c0_i32_0 = arith.constant 0 : i32
    %c0_i32_1 = arith.constant 0 : i32
    return %c0_i32, %c0_i32_0 : i32, i32
  }
  func.func @transform_8(%arg0: i32) -> (i32, i32) {
    %c0_i32 = arith.constant 0 : i32
    %c0_i32_0 = arith.constant 0 : i32
    %c0_i32_1 = arith.constant 0 : i32
    return %c0_i32, %c0_i32_0 : i32, i32
  }
  func.func @transform_9(%arg0: i32) -> (i32, i32) {
    %c0_i32 = arith.constant 0 : i32
    %c0_i32_0 = arith.constant 0 : i32
    %c0_i32_1 = arith.constant 0 : i32
    return %c0_i32, %c0_i32_0 : i32, i32
  }
  func.func @transform_10(%arg0: i32) -> (i32, i32) {
    %c0_i32 = arith.constant 0 : i32
    %c0_i32_0 = arith.constant 0 : i32
    %c0_i32_1 = arith.constant 0 : i32
    return %c0_i32, %c0_i32_0 : i32, i32
  }
  func.func @transform_11(%arg0: i32) -> (i32, i32) {
    %c0_i32 = arith.constant 0 : i32
    %c0_i32_0 = arith.constant 0 : i32
    %c0_i32_1 = arith.constant 0 : i32
    return %c0_i32, %c0_i32_0 : i32, i32
  }
  func.func @transform_12(%arg0: i32) -> (i32, i32) {
    %c0_i32 = arith.constant 0 : i32
    %c0_i32_0 = arith.constant 0 : i32
    return %arg0, %c0_i32 : i32, i32
  }
  func.func @transform_13(%arg0: i32) -> (i32, i32, i32) {
    %c0_i32 = arith.constant 0 : i32
    %c0_i32_0 = arith.constant 0 : i32
    %c0_i32_1 = arith.constant 0 : i32
    %c0_i32_2 = arith.constant 0 : i32
    return %c0_i32, %c0_i32_0, %c0_i32_1 : i32, i32, i32
  }
  func.func @transform_14(%arg0: i32) -> (i32, i32, i32) {
    %c0_i32 = arith.constant 0 : i32
    %c0_i32_0 = arith.constant 0 : i32
    %c0_i32_1 = arith.constant 0 : i32
    %c0_i32_2 = arith.constant 0 : i32
    return %c0_i32, %c0_i32_0, %c0_i32_1 : i32, i32, i32
  }
}

</mosaic_0001>

<bundles_post_ra>
// kernel: tpu_custom_call.1
= control target key start
LH: loop header
LB: loop body
LE: loop exit
PB: predicated region body
PF: predicated region fallthrough
CT: control target
= control target key end

     0   :  { %20 = vsyncpa [#allocation6], 0  ;;  %vm62_vm0 = vcmask 64512   ;;  %s2385_s0 = inlined_call_operand.vmem [shape: f32[32,8], index: 0, kind: input, shape index: {}]   ;;  %s2386_s1 = inlined_call_operand.vmem [shape: f32[8,32], index: 1, kind: input, shape index: {}]   ;;  %s2387_s2 = inlined_call_operand.vmem [shape: f32[1,32], index: 2, kind: input, shape index: {}]   ;;  %s2388_s3 = inlined_call_operand.vmem [shape: f32[32,128], index: 3, kind: input, shape index: {}]   ;;  %s2389_s4 = inlined_call_operand.vmem [shape: f32[1,128], index: 4, kind: input, shape index: {}]   ;;  %s2390_s5 = inlined_call_operand.vmem [shape: f32[32,128], index: 5, kind: input, shape index: {}]   ;;  %s2391_s6 = inlined_call_operand.vmem [shape: f32[32,384], index: 6, kind: input, shape index: {}]   ;;  %s2392_s7 = inlined_call_operand.vmem [shape: f32[1,384], index: 7, kind: input, shape index: {}]   ;;  %s2393_s8 = inlined_call_operand.vmem [shape: f32[384,192], index: 8, kind: input, shape index: {}]   ;;  %s2394_s9 = inlined_call_operand.vmem [shape: f32[1,192], index: 9, kind: input, shape index: {}]   ;;  %s2395_s10 = inlined_call_operand.vmem [shape: f32[192,3], index: 10, kind: input, shape index: {}]   ;;  %s2396_s11 = inlined_call_operand.vmem [shape: f32[1,3], index: 11, kind: input, shape index: {}]   ;;  %s2397_s12 = inlined_call_operand.vmem [shape: f32[32,3], index: 12, kind: output, shape index: {0}]   ;;  %s2398_s13 = inlined_call_operand.hbm [shape: f32[1,4,32], index: 13, kind: output, shape index: {1}]   ;;  %s2399_s14 = inlined_call_operand.hbm [shape: f32[1,4,32], index: 14, kind: output, shape index: {2}]  }
   0x1   :  { %v57_v0 = vld [vmem:[%s2386_s1] sm:$0xff]  ;;  %v1653_v2 = vld [vmem:[%s2390_s5 + $0x18] sm:$0xff]  ;;  %v1659_v3 = vld [vmem:[%s2390_s5 + $0x10] sm:$0xff] }
   0x2   :  { %v53_v1 = vld [vmem:[%s2385_s0] sm:$0xff]  ;;  %90 = vmatpush.msra.mxu0 %v57_v0  ;;  %178 = vmatpush.msra.mxu2 %v1653_v2  ;;  %v111_v4 = vld [vmem:[%s2388_s3 + $0x18] sm:$0xff]  ;;  %v1668_v5 = vld [vmem:[%s2390_s5 + $0x8] sm:$0xff] }
   0x3   :  { %1398 = vmatmul.msk.f32.vlgmr.msra.gmra.mxu0 %vm62_vm0, %v53_v1  ;;  %141 = vmatpush.msra.mxu1 %v111_v4 }
   0x4   :  { %179 = vmatpush.msra.mxu2 %v1659_v3  ;;  %261 = vmatpush.msra.mxu3 %v1653_v2 }
   0x5   :  { %21 = vsyncpa [#allocation8], 0  ;;  %vm50_vm1 = vcmask 257024   ;;  %v1563_v6 = vmov 0.0   ;;  %v110_v7 = vld [vmem:[%s2388_s3 + $0x10] sm:$0xff]  ;;  %v1683_v8 = vld [vmem:[%s2390_s5] sm:$0xff] }
   0x6   :  { %180 = vmatpush.msra.mxu2 %v1668_v5  ;;  %262 = vmatpush.msra.mxu3 %v1659_v3  ;;  %51 = vst.msk [vmem:[#allocation2] sm:$0xf] %vm50_vm1, %v1563_v6  ;;  %vm116_vm2 = vcmask 261120   ;;  %v109_v10 = vld [vmem:[%s2388_s3 + $0x8] sm:$0xff]  ;;  %v108_v11 = vld [vmem:[%s2388_s3] sm:$0xff]  ;;  %s1565_s18 = smov 32  }
   0x7   :  { %52 = vst.msk [vmem:[#allocation3] sm:$0xf] %vm50_vm1, %v1563_v6  ;;  %142 = vmatpush.msra.mxu1 %v110_v7  ;;  %v1709_v12 = vld [vmem:[%s2387_s2] ss:$0 sm:$0xff]  ;;  %s1564_s2 = smov 64   ;;  %vm320_vm11 = vcmask 261124  }
   0x8   :  { %263 = vmatpush.msra.mxu3 %v1668_v5  ;;  %181 = vmatpush.msra.mxu2 %v1683_v8  ;;  %v1716_v16 = vld [vmem:[%s2389_s4] ss:$0 sm:$0xff]  ;;  %s1566_s4 = smov 96   ;;  %s1371_s21 = sshll.u32 %s2398_s13, 4  ;;  %s1372_s21 = int_to_ptr.hbm [resolvable:$true] %s1371_s21 }
   0x9   :  { %143 = vmatpush.msra.mxu1 %v109_v10  ;;  %s1568_s1 = smov [#allocation7]  }
   0xa   :  { %264 = vmatpush.msra.mxu3 %v1683_v8  ;;  %348 = vmatpush.msrb.mxu2 %v1653_v2  ;;  %s1380_s22 = sshll.u32 %s1568_s1, 4  ;;  %s1381_s22 = int_to_ptr.vmem [resolvable:$true] %s1380_s22 }
   0xb   :  { %144 = vmatpush.msra.mxu1 %v108_v11 }
   0xc   :  { %430 = vmatpush.msrb.mxu3 %v1653_v2  ;;  %349 = vmatpush.msrb.mxu2 %v1659_v3 }
   0xd   :  { %v158_v9 = vld [vmem:[#allocation2] sm:$0xf] }
   0xe   :  { %1406 = vmatmul.msk.f32.vlgmr.msra.gmra.mxu2 %vm116_vm2, %v158_v9  ;;  %431 = vmatpush.msrb.mxu3 %v1659_v3  ;;  %v207_v22 = vld [vmem:[#allocation3] sm:$0xf] }
   0xf   :  { %350 = vmatpush.msrb.mxu2 %v1668_v5 }
  0x10   :  { %432 = vmatpush.msrb.mxu3 %v1668_v5 }
  0x11   :  { %351 = vmatpush.msrb.mxu2 %v1683_v8 }
  0x12   :  { %433 = vmatpush.msrb.mxu3 %v1683_v8 }
  0x13   :  { %516 = vmatpush.msra.mxu2 %v1653_v2 }
  0x15   :  { %517 = vmatpush.msra.mxu2 %v1659_v3 }
  0x17   :  { %518 = vmatpush.msra.mxu2 %v1668_v5 }
  0x19   :  { %519 = vmatpush.msra.mxu2 %v1683_v8 }
  0x80   :  { %v92_v13 = vpop.f32.mrf.mxu0 }
  0x81   :  { %v93_v14 = vadd.f32 %v1709_v12, %v92_v13 }
  0x83   :  { %v104_v15 = vmax.f32 %v93_v14, 0.0 }
  0x85   :  { %1402 = vmatmul.msk.f32.vlgmr.msra.gmra.mxu1 %vm116_vm2, %v104_v15  ;;  %v54_v15 = vld [vmem:[%s2385_s0 + $0x8] sm:$0xff] }
  0x86   :  { %1399 = vmatmul.msk.f32.gmra.mxu0 %vm62_vm0, %v54_v15 }
  0x91   :  { %v183_v18 = vpop.f32.mrf.mxu2 }
 0x102   :  { %v146_v17 = vpop.f32.mrf.mxu1 }
 0x103   :  { %v147_v19 = vadd.f32 %v1716_v16, %v146_v17  ;;  %v55_v17 = vld [vmem:[%s2385_s0 + $0x10] sm:$0xff] }
 0x104   :  { %1400 = vmatmul.msk.f32.gmra.mxu0 %vm62_vm0, %v55_v17 }
 0x105   :  { %v186_v20 = vadd.f32 %v183_v18, %v147_v19  ;;  %v56_v18 = vld [vmem:[%s2385_s0 + $0x18] sm:$0xff] }
 0x107   :  { %1447 = vtanh.f32 %v186_v20  ;;  %v1407_v23 = vmul.f32 -1.442695, %v186_v20 }
 0x109   :  { %1449 = vpow2.f32 %v1407_v23  ;;  %v95_v23 = vpop.f32.mrf.mxu0 }
 0x10c   :  { %1401 = vmatmul.msk.f32.gmra.mxu0 %vm62_vm0, %v56_v18 }
 0x10d   :  { %v1448_v21 = vpop.eup %1447 }
 0x10e   :  { %214 = vrot.lane.b32.xlu0 %v1448_v21, %s1564_s2 }
 0x10f   :  { %v1450_v24 = vpop.eup %1449 }
 0x110   :  { %v190_v25 = vadd.f32 1.0, %v1450_v24  ;;  %v96_v24 = vadd.f32 %v1709_v12, %v95_v23 }
 0x112   :  { %1451 = vrcp.f32 %v190_v25  ;;  %v202_v31 = vand.u32 2147483648, %v190_v25  ;;  %vm196_vm4 = vweird.f32 %v190_v25  ;;  %v200_v32 = vand.u32 2147483647, %v190_v25 }
 0x114   :  { %v203_v34 = vor.u32 1.1754944e-38, %v202_v31  ;;  %vm201_vm6 = vcmp.eq.f32.partialorder %v200_v32, 8.507059e+37  ;;  %v845_v32 = vld [vmem:[%s2391_s6 + $0x48] sm:$0xff] }
 0x115   :  { %880 = vmatpush.msrb.mxu0 %v845_v32 }
 0x116   :  { %209 = vrot.lane.b32.xlu0 %v207_v22, %s1565_s18 }
 0x118   :  { %v1452_v26 = vpop.eup %1451 }
 0x119   :  { %v192_v27 = vmul.f32 %v1452_v26, %v190_v25  ;;  %vm197_vm3 = vweird.f32 %v1452_v26  ;;  %v105_v25 = vmax.f32 %v96_v24, 0.0 }
 0x11a   :  { %vm198_vm5 = vmor %vm196_vm4, %vm197_vm3 }
 0x11b   :  { %v193_v28 = vsub.f32 1.0, %v192_v27  ;;  %1403 = vmatmul.msk.f32.gmra.mxu1 %vm116_vm2, %v105_v25 }
 0x11d   :  { %v194_v29 = vmul.f32 %v1452_v26, %v193_v28 }
 0x11f   :  { %v195_v30 = vadd.f32 %v1452_v26, %v194_v29 }
 0x121   :  { %v199_v33 = vsel %vm198_vm5, %v1452_v26, %v195_v30 }
 0x122   :  { %v204_v36 = vsel %vm201_vm6, %v203_v34, %v199_v33  ;;  %v846_v33 = vld [vmem:[%s2391_s6 + $0x50] sm:$0xff] }
 0x123   :  { %v842_v34 = vld [vmem:[%s2391_s6 + $0x30] sm:$0xff]  ;;  %909 = vmatpush.msrb.mxu1 %v846_v33 }
 0x124   :  { %881 = vmatpush.msrb.mxu0 %v842_v34 }
 0x180   :  { %v215_v35 = vpop.permute.xlu0 %214 }
 0x181   :  { %v217_v37 = vmul.f32 %v215_v35, %v204_v36  ;;  %v98_v26 = vpop.f32.mrf.mxu0  ;;  %v839_v35 = vld [vmem:[%s2391_s6 + $0x18] sm:$0xff] }
 0x182   :  { %v99_v27 = vadd.f32 %v1709_v12, %v98_v26  ;;  %882 = vmatpush.msrb.mxu0 %v839_v35 }
 0x183   :  { %219 = vrot.lane.b32.xlu1 %v217_v37, %s1565_s18  ;;  %v836_v37 = vld [vmem:[%s2391_s6] sm:$0xff] }
 0x184   :  { %v106_v28 = vmax.f32 %v99_v27, 0.0  ;;  %883 = vmatpush.msrb.mxu0 %v836_v37 }
 0x186   :  { %1404 = vmatmul.msk.f32.gmra.mxu1 %vm116_vm2, %v106_v28 }
 0x188   :  { %v210_v38 = vpop.permute.xlu0 %209 }
 0x189   :  { %v212_v39 = vmul.f32 %v210_v38, %v204_v36  ;;  %v101_v29 = vpop.f32.mrf.mxu0  ;;  %v837_v38 = vld [vmem:[%s2391_s6 + $0x8] sm:$0xff] }
 0x18a   :  { %v102_v30 = vadd.f32 %v1709_v12, %v101_v29  ;;  %v843_v12 = vld [vmem:[%s2391_s6 + $0x38] sm:$0xff] }
 0x18b   :  { %910 = vmatpush.msrb.mxu1 %v843_v12 }
 0x18c   :  { %v107_v31 = vmax.f32 %v102_v30, 0.0 }
 0x18e   :  { %1405 = vmatmul.msk.f32.gmra.mxu1 %vm116_vm2, %v107_v31 }
 0x1f5   :  { %v220_v40 = vpop.permute.xlu1 %219 }
 0x1f6   :  { %v222_v41 = vadd.f32 %v220_v40, %v212_v39 }
 0x1f8   :  { %1453 = vtanh.f32 %v222_v41 }
 0x1fe   :  { %v1454_v42 = vpop.eup %1453 }
 0x1ff   :  { %225 = vrot.lane.b32.xlu1 %v1454_v42, %s1564_s2  ;;  %v149_v42 = vpop.f32.mrf.mxu1 }
 0x271   :  { %v226_v43 = vpop.permute.xlu1 %225 }
 0x272   :  { %v228_v44 = vmul.f32 %v226_v43, %v204_v36  ;;  %v840_v36 = vld [vmem:[%s2391_s6 + $0x20] sm:$0xff]  ;;  %v150_v43 = vadd.f32 %v1716_v16, %v149_v42 }
 0x273   :  { %911 = vmatpush.msrb.mxu1 %v840_v36 }
 0x274   :  { %236 = vrot.lane.b32.xlu2 %v228_v44, %s1565_s18 }
 0x275   :  { %912 = vmatpush.msrb.mxu1 %v837_v38 }
 0x27c   :  { %230 = vrot.lane.b32.xlu2 %v222_v41, %s1566_s4 }
 0x2ce   :  { %v237_v45 = vpop.permute.xlu2 %236 }
 0x2cf   :  { %239 = vst.msk [vmem:[#allocation2] sm:$0xf] %vm50_vm1, %v237_v45 }
 0x2d0   :  { %240 = vst.msk [vmem:[#allocation4] sm:$0xf] %vm50_vm1, %v237_v45 }
 0x2d6   :  { %v231_v46 = vpop.permute.xlu2 %230  ;;  %v241_v47 = vld [vmem:[#allocation2] sm:$0xf] }
 0x2d7   :  { %234 = vst.msk [vmem:[#allocation3] sm:$0xf] %vm50_vm1, %v231_v46  ;;  %1408 = vmatmul.msk.f32.vlgmr.msra.gmra.mxu3 %vm116_vm2, %v241_v47 }
 0x2d8   :  { %598 = vmatpush.msra.mxu3 %v1653_v2 }
 0x2da   :  { %599 = vmatpush.msra.mxu3 %v1659_v3 }
 0x2dc   :  { %600 = vmatpush.msra.mxu3 %v1668_v5 }
 0x2de   :  { %v293_v48 = vld [vmem:[#allocation3] sm:$0xf]  ;;  %601 = vmatpush.msra.mxu3 %v1683_v8 }
 0x2df   :  { %v295_v49 = vrot.slane %v293_v48, 4 }
 0x2e1   :  { %296 = vrot.lane.b32.xlu1 %v295_v49, %s1565_s18 }
 0x353   :  { %v297_v9 = vpop.permute.xlu1 %296 }
 0x35a   :  { %v266_v50 = vpop.f32.mrf.mxu3 }
 0x35b   :  { %v270_v51 = vrot.slane %v266_v50, 4 }
 0x35d   :  { %v272_v52 = vadd.f32 %v270_v51, %v147_v19 }
 0x35f   :  { %1455 = vtanh.f32 %v272_v52  ;;  %v1409_v54 = vmul.f32 -1.442695, %v272_v52 }
 0x361   :  { %1457 = vpow2.f32 %v1409_v54 }
 0x365   :  { %v1456_v53 = vpop.eup %1455 }
 0x366   :  { %301 = vrot.lane.b32.xlu0 %v1456_v53, %s1564_s2 }
 0x367   :  { %v1458_v55 = vpop.eup %1457 }
 0x368   :  { %v276_v56 = vadd.f32 1.0, %v1458_v55 }
 0x36a   :  { %1459 = vrcp.f32 %v276_v56  ;;  %v288_v62 = vand.u32 2147483648, %v276_v56  ;;  %vm282_vm8 = vweird.f32 %v276_v56  ;;  %v286_v63 = vand.u32 2147483647, %v276_v56 }
 0x36c   :  { %v289_v1 = vor.u32 1.1754944e-38, %v288_v62  ;;  %vm287_vm10 = vcmp.eq.f32.partialorder %v286_v63, 8.507059e+37 }
 0x370   :  { %v1460_v57 = vpop.eup %1459 }
 0x371   :  { %v278_v58 = vmul.f32 %v1460_v57, %v276_v56  ;;  %vm283_vm7 = vweird.f32 %v1460_v57 }
 0x372   :  { %vm284_vm9 = vmor %vm282_vm8, %vm283_vm7 }
 0x373   :  { %v279_v59 = vsub.f32 1.0, %v278_v58 }
 0x375   :  { %v280_v60 = vmul.f32 %v1460_v57, %v279_v59 }
 0x377   :  { %v281_v61 = vadd.f32 %v1460_v57, %v280_v60 }
 0x379   :  { %v285_v0 = vsel %vm284_vm9, %v1460_v57, %v281_v61 }
 0x37a   :  { %v290_v6 = vsel %vm287_vm10, %v289_v1, %v285_v0 }
 0x37b   :  { %v299_v10 = vmul.f32 %v297_v9, %v290_v6 }
 0x3d8   :  { %v302_v4 = vpop.permute.xlu0 %301 }
 0x3d9   :  { %v304_v7 = vmul.f32 %v302_v4, %v290_v6 }
 0x3db   :  { %306 = vrot.lane.b32.xlu2 %v304_v7, %s1565_s18 }
 0x435   :  { %v307_v11 = vpop.permute.xlu2 %306 }
 0x436   :  { %v309_v13 = vadd.f32 %v307_v11, %v299_v10 }
 0x438   :  { %1461 = vtanh.f32 %v309_v13  ;;  %317 = vrot.lane.b32.xlu2 %v309_v13, %s1566_s4 }
 0x43e   :  { %v1462_v14 = vpop.eup %1461 }
 0x43f   :  { %312 = vrot.lane.b32.xlu0 %v1462_v14, %s1564_s2 }
 0x492   :  { %v318_v19 = vpop.permute.xlu2 %317 }
 0x493   :  { %321 = vst.msk [vmem:[#allocation3 - $0x4] sm:$0xf0] %vm320_vm11, %v318_v19 }
 0x49a   :  { %v377_v22 = vld [vmem:[#allocation3] sm:$0xf] }
 0x4b1   :  { %v313_v20 = vpop.permute.xlu0 %312 }
 0x4b2   :  { %v315_v21 = vmul.f32 %v313_v20, %v290_v6 }
 0x4b4   :  { %323 = vrot.lane.b32.xlu1 %v315_v21, %s1565_s18 }
 0x4bc   :  { %379 = vrot.lane.b32.xlu1 %v377_v22, %s1565_s18 }
 0x526   :  { %v324_v39 = vpop.permute.xlu1 %323 }
 0x527   :  { %326 = vst.msk [vmem:[#allocation2 - $0x4] sm:$0xf0] %vm320_vm11, %v324_v39 }
 0x528   :  { %327 = vst.msk [vmem:[#allocation4] sm:$0xf0] %vm320_vm11, %v324_v39 }
 0x52e   :  { %v328_v40 = vld [vmem:[#allocation2] sm:$0xf]  ;;  %v380_v62 = vpop.permute.xlu1 %379 }
 0x52f   :  { %1410 = vmatmul.msk.f32.vlgmr.msrb.gmra.mxu2 %vm116_vm2, %v328_v40  ;;  %v1786_v41 = vld [vmem:[#allocation4] sm:$0xff] }
 0x530   :  { %1422 = vmatmul.msk.f32.vlgmr.msrb.gmra.mxu0 %vm116_vm2, %v1786_v41  ;;  %1426 = vmatmul.msk.f32.vlgmr.msrb.gmra.mxu1 %vm116_vm2, %v1786_v41 }
 0x531   :  { %684 = vmatpush.msrb.mxu2 %v1653_v2 }
 0x533   :  { %685 = vmatpush.msrb.mxu2 %v1659_v3 }
 0x535   :  { %686 = vmatpush.msrb.mxu2 %v1668_v5 }
 0x537   :  { %687 = vmatpush.msrb.mxu2 %v1683_v8 }
 0x5b2   :  { %v353_v44 = vpop.f32.mrf.mxu2 }
 0x5b3   :  { %v356_v45 = vadd.f32 %v353_v44, %v150_v43 }
 0x5b5   :  { %1463 = vtanh.f32 %v356_v45  ;;  %v1411_v47 = vmul.f32 -1.442695, %v356_v45 }
 0x5b7   :  { %1465 = vpow2.f32 %v1411_v47 }
 0x5bb   :  { %v1464_v46 = vpop.eup %1463 }
 0x5bc   :  { %384 = vrot.lane.b32.xlu0 %v1464_v46, %s1564_s2 }
 0x5bd   :  { %v1466_v48 = vpop.eup %1465 }
 0x5be   :  { %v360_v49 = vadd.f32 1.0, %v1466_v48 }
 0x5c0   :  { %1467 = vrcp.f32 %v360_v49  ;;  %v372_v55 = vand.u32 2147483648, %v360_v49  ;;  %vm366_vm13 = vweird.f32 %v360_v49  ;;  %v370_v56 = vand.u32 2147483647, %v360_v49 }
 0x5c2   :  { %v373_v58 = vor.u32 1.1754944e-38, %v372_v55  ;;  %vm371_vm15 = vcmp.eq.f32.partialorder %v370_v56, 8.507059e+37 }
 0x5c6   :  { %v1468_v50 = vpop.eup %1467 }
 0x5c7   :  { %v362_v51 = vmul.f32 %v1468_v50, %v360_v49  ;;  %vm367_vm12 = vweird.f32 %v1468_v50 }
 0x5c8   :  { %vm368_vm14 = vmor %vm366_vm13, %vm367_vm12 }
 0x5c9   :  { %v363_v52 = vsub.f32 1.0, %v362_v51 }
 0x5cb   :  { %v364_v53 = vmul.f32 %v1468_v50, %v363_v52 }
 0x5cd   :  { %v365_v54 = vadd.f32 %v1468_v50, %v364_v53 }
 0x5cf   :  { %v369_v57 = vsel %vm368_vm14, %v1468_v50, %v365_v54 }
 0x5d0   :  { %v374_v60 = vsel %vm371_vm15, %v373_v58, %v369_v57 }
 0x5d1   :  { %v382_v63 = vmul.f32 %v380_v62, %v374_v60 }
 0x62e   :  { %v385_v59 = vpop.permute.xlu0 %384 }
 0x62f   :  { %v387_v61 = vmul.f32 %v385_v59, %v374_v60 }
 0x631   :  { %389 = vrot.lane.b32.xlu2 %v387_v61, %s1565_s18 }
 0x68b   :  { %v390_v0 = vpop.permute.xlu2 %389 }
 0x68c   :  { %v392_v1 = vadd.f32 %v390_v0, %v382_v63 }
 0x68e   :  { %1469 = vtanh.f32 %v392_v1  ;;  %400 = vrot.lane.b32.xlu2 %v392_v1, %s1566_s4 }
 0x694   :  { %v1470_v4 = vpop.eup %1469 }
 0x695   :  { %395 = vrot.lane.b32.xlu0 %v1470_v4, %s1564_s2 }
 0x6e8   :  { %v401_v6 = vpop.permute.xlu2 %400 }
 0x6e9   :  { %403 = vst.msk [vmem:[#allocation3] sm:$0xf] %vm50_vm1, %v401_v6 }
 0x6f0   :  { %v462_v10 = vld [vmem:[#allocation3] sm:$0xf] }
 0x6f1   :  { %v464_v11 = vrot.slane %v462_v10, 4 }
 0x707   :  { %v396_v7 = vpop.permute.xlu0 %395 }
 0x708   :  { %v398_v9 = vmul.f32 %v396_v7, %v374_v60 }
 0x70a   :  { %405 = vrot.lane.b32.xlu1 %v398_v9, %s1565_s18 }
 0x712   :  { %465 = vrot.lane.b32.xlu1 %v464_v11, %s1565_s18 }
 0x77c   :  { %v406_v13 = vpop.permute.xlu1 %405 }
 0x77d   :  { %408 = vst.msk [vmem:[#allocation2] sm:$0xf] %vm50_vm1, %v406_v13 }
 0x77e   :  { %409 = vst.msk [vmem:[#allocation4 + $0x8] sm:$0xf] %vm50_vm1, %v406_v13 }
 0x784   :  { %v410_v14 = vld [vmem:[#allocation2] sm:$0xf]  ;;  %v466_v31 = vpop.permute.xlu1 %465 }
 0x785   :  { %1412 = vmatmul.msk.f32.vlgmr.msrb.gmra.mxu3 %vm116_vm2, %v410_v14 }
 0x786   :  { %766 = vmatpush.msrb.mxu3 %v1653_v2 }
 0x788   :  { %767 = vmatpush.msrb.mxu3 %v1659_v3 }
 0x78a   :  { %768 = vmatpush.msrb.mxu3 %v1668_v5 }
 0x78c   :  { %769 = vmatpush.msrb.mxu3 %v1683_v8 }
 0x808   :  { %v435_v15 = vpop.f32.mrf.mxu3 }
 0x809   :  { %v439_v17 = vrot.slane %v435_v15, 4 }
 0x80b   :  { %v441_v18 = vadd.f32 %v439_v17, %v150_v43  ;;  %v152_v43 = vpop.f32.mrf.mxu1 }
 0x80c   :  { %v153_v44 = vadd.f32 %v1716_v16, %v152_v43  ;;  %v844_v43 = vld [vmem:[%s2391_s6 + $0x40] sm:$0xff] }
 0x80d   :  { %1471 = vtanh.f32 %v441_v18  ;;  %v1413_v20 = vmul.f32 -1.442695, %v441_v18 }
 0x80f   :  { %1473 = vpow2.f32 %v1413_v20 }
 0x813   :  { %v1472_v19 = vpop.eup %1471 }
 0x814   :  { %470 = vrot.lane.b32.xlu0 %v1472_v19, %s1564_s2 }
 0x815   :  { %v1474_v21 = vpop.eup %1473 }
 0x816   :  { %v445_v22 = vadd.f32 1.0, %v1474_v21 }
 0x818   :  { %1475 = vrcp.f32 %v445_v22  ;;  %v457_v5 = vand.u32 2147483648, %v445_v22  ;;  %vm451_vm3 = vweird.f32 %v445_v22  ;;  %v455_v8 = vand.u32 2147483647, %v445_v22 }
 0x81a   :  { %v458_v27 = vor.u32 1.1754944e-38, %v457_v5  ;;  %vm456_vm5 = vcmp.eq.f32.partialorder %v455_v8, 8.507059e+37 }
 0x81e   :  { %v1476_v23 = vpop.eup %1475 }
 0x81f   :  { %v447_v2 = vmul.f32 %v1476_v23, %v445_v22  ;;  %vm452_vm0 = vweird.f32 %v1476_v23 }
 0x820   :  { %vm453_vm4 = vmor %vm451_vm3, %vm452_vm0 }
 0x821   :  { %v448_v24 = vsub.f32 1.0, %v447_v2 }
 0x823   :  { %v449_v3 = vmul.f32 %v1476_v23, %v448_v24 }
 0x825   :  { %v450_v25 = vadd.f32 %v1476_v23, %v449_v3 }
 0x827   :  { %v454_v26 = vsel %vm453_vm4, %v1476_v23, %v450_v25 }
 0x828   :  { %v459_v29 = vsel %vm456_vm5, %v458_v27, %v454_v26 }
 0x829   :  { %v468_v32 = vmul.f32 %v466_v31, %v459_v29 }
 0x886   :  { %v471_v28 = vpop.permute.xlu0 %470 }
 0x887   :  { %v473_v30 = vmul.f32 %v471_v28, %v459_v29 }
 0x889   :  { %475 = vrot.lane.b32.xlu2 %v473_v30, %s1565_s18 }
 0x8e3   :  { %v476_v33 = vpop.permute.xlu2 %475 }
 0x8e4   :  { %v478_v34 = vadd.f32 %v476_v33, %v468_v32 }
 0x8e6   :  { %1477 = vtanh.f32 %v478_v34  ;;  %486 = vrot.lane.b32.xlu2 %v478_v34, %s1566_s4 }
 0x8ec   :  { %v1478_v12 = vpop.eup %1477 }
 0x8ed   :  { %481 = vrot.lane.b32.xlu0 %v1478_v12, %s1564_s2 }
 0x940   :  { %v487_v35 = vpop.permute.xlu2 %486 }
 0x941   :  { %489 = vst.msk [vmem:[#allocation3 - $0x4] sm:$0xf0] %vm320_vm11, %v487_v35 }
 0x948   :  { %v545_v38 = vld [vmem:[#allocation3] sm:$0xf] }
 0x95f   :  { %v482_v36 = vpop.permute.xlu0 %481 }
 0x960   :  { %v484_v37 = vmul.f32 %v482_v36, %v459_v29 }
 0x962   :  { %491 = vrot.lane.b32.xlu1 %v484_v37, %s1565_s18 }
 0x96a   :  { %547 = vrot.lane.b32.xlu1 %v545_v38, %s1565_s18 }
 0x9d4   :  { %v492_v39 = vpop.permute.xlu1 %491 }
 0x9d5   :  { %494 = vst.msk [vmem:[#allocation2 - $0x4] sm:$0xf0] %vm320_vm11, %v492_v39 }
 0x9d6   :  { %495 = vst.msk [vmem:[#allocation4 + $0x8] sm:$0xf0] %vm320_vm11, %v492_v39 }
 0x9dc   :  { %v496_v40 = vld [vmem:[#allocation2] sm:$0xf]  ;;  %v548_v63 = vpop.permute.xlu1 %547 }
 0x9dd   :  { %1414 = vmatmul.msk.f32.vlgmr.msra.gmra.mxu2 %vm116_vm2, %v496_v40  ;;  %v1821_v42 = vld [vmem:[#allocation4 + $0x8] sm:$0xff]  ;;  %v847_v40 = vld [vmem:[%s2391_s6 + $0x58] sm:$0xff] }
 0x9de   :  { %1423 = vmatmul.msk.f32.gmra.mxu0 %vm116_vm2, %v1821_v42  ;;  %1427 = vmatmul.msk.f32.gmra.mxu1 %vm116_vm2, %v1821_v42 }
 0x9df   :  { %938 = vmatpush.msra.mxu2 %v847_v40 }
 0x9e1   :  { %939 = vmatpush.msra.mxu2 %v844_v43 }
 0xa60   :  { %v521_v45 = vpop.f32.mrf.mxu2 }
 0xa61   :  { %v524_v46 = vadd.f32 %v521_v45, %v153_v44  ;;  %v838_v45 = vld [vmem:[%s2391_s6 + $0x10] sm:$0xff] }
 0xa63   :  { %1479 = vtanh.f32 %v524_v46  ;;  %v1415_v48 = vmul.f32 -1.442695, %v524_v46 }
 0xa65   :  { %1481 = vpow2.f32 %v1415_v48 }
 0xa69   :  { %v1480_v47 = vpop.eup %1479 }
 0xa6a   :  { %552 = vrot.lane.b32.xlu0 %v1480_v47, %s1564_s2 }
 0xa6b   :  { %v1482_v49 = vpop.eup %1481 }
 0xa6c   :  { %v528_v50 = vadd.f32 1.0, %v1482_v49  ;;  %v155_v49 = vpop.f32.mrf.mxu1 }
 0xa6e   :  { %1483 = vrcp.f32 %v528_v50  ;;  %v540_v56 = vand.u32 2147483648, %v528_v50  ;;  %vm534_vm7 = vweird.f32 %v528_v50  ;;  %v538_v57 = vand.u32 2147483647, %v528_v50 }
 0xa70   :  { %v541_v59 = vor.u32 1.1754944e-38, %v540_v56  ;;  %vm539_vm9 = vcmp.eq.f32.partialorder %v538_v57, 8.507059e+37 }
 0xa74   :  { %v1484_v51 = vpop.eup %1483 }
 0xa75   :  { %v530_v52 = vmul.f32 %v1484_v51, %v528_v50  ;;  %vm535_vm6 = vweird.f32 %v1484_v51  ;;  %v1868_v50 = vadd.f32 %v1716_v16, %v155_v49 }
 0xa76   :  { %vm536_vm8 = vmor %vm534_vm7, %vm535_vm6 }
 0xa77   :  { %v531_v53 = vsub.f32 1.0, %v530_v52 }
 0xa79   :  { %v532_v54 = vmul.f32 %v1484_v51, %v531_v53 }
 0xa7b   :  { %v533_v55 = vadd.f32 %v1484_v51, %v532_v54 }
 0xa7d   :  { %v537_v58 = vsel %vm536_vm8, %v1484_v51, %v533_v55 }
 0xa7e   :  { %v542_v61 = vsel %vm539_vm9, %v541_v59, %v537_v58 }
 0xa7f   :  { %v550_v0 = vmul.f32 %v548_v63, %v542_v61 }
 0xadc   :  { %v553_v60 = vpop.permute.xlu0 %552 }
 0xadd   :  { %v555_v62 = vmul.f32 %v553_v60, %v542_v61 }
 0xadf   :  { %557 = vrot.lane.b32.xlu2 %v555_v62, %s1565_s18 }
 0xb39   :  { %v558_v1 = vpop.permute.xlu2 %557 }
 0xb3a   :  { %v560_v4 = vadd.f32 %v558_v1, %v550_v0 }
 0xb3c   :  { %1485 = vtanh.f32 %v560_v4  ;;  %568 = vrot.lane.b32.xlu2 %v560_v4, %s1566_s4 }
 0xb42   :  { %v1486_v6 = vpop.eup %1485 }
 0xb43   :  { %563 = vrot.lane.b32.xlu0 %v1486_v6, %s1564_s2 }
 0xb96   :  { %v569_v7 = vpop.permute.xlu2 %568 }
 0xb97   :  { %571 = vst.msk [vmem:[#allocation3] sm:$0xf] %vm50_vm1, %v569_v7 }
 0xb9e   :  { %v630_v11 = vld [vmem:[#allocation3] sm:$0xf] }
 0xb9f   :  { %v632_v13 = vrot.slane %v630_v11, 4 }
 0xbb5   :  { %v564_v9 = vpop.permute.xlu0 %563 }
 0xbb6   :  { %v566_v10 = vmul.f32 %v564_v9, %v542_v61 }
 0xbb8   :  { %573 = vrot.lane.b32.xlu1 %v566_v10, %s1565_s18 }
 0xbc0   :  { %633 = vrot.lane.b32.xlu1 %v632_v13, %s1565_s18  ;;  %v997_v13 = vld [vmem:[%s2393_s8 + $0xf0] sm:$0xff] }
 0xc2a   :  { %v574_v14 = vpop.permute.xlu1 %573 }
 0xc2b   :  { %576 = vst.msk [vmem:[#allocation2] sm:$0xf] %vm50_vm1, %v574_v14 }
 0xc2c   :  { %577 = vst.msk [vmem:[#allocation4 + $0x10] sm:$0xf] %vm50_vm1, %v574_v14  ;;  %v995_v14 = vld [vmem:[%s2393_s8 + $0xe0] sm:$0xff] }
 0xc32   :  { %v578_v15 = vld [vmem:[#allocation2] sm:$0xf]  ;;  %v634_v32 = vpop.permute.xlu1 %633 }
 0xc33   :  { %1416 = vmatmul.msk.f32.vlgmr.msra.gmra.mxu3 %vm116_vm2, %v578_v15  ;;  %v993_v15 = vld [vmem:[%s2393_s8 + $0xd0] sm:$0xff] }
 0xc34   :  { %1069 = vmatpush.msra.mxu3 %v997_v13  ;;  %v1025_v13 = vld [vmem:[%s2393_s8 + $0x1d0] sm:$0xff] }
 0xc36   :  { %1070 = vmatpush.msra.mxu3 %v995_v14  ;;  %v1057_v14 = vld [vmem:[%s2393_s8 + $0x2d0] sm:$0xff] }
 0xc38   :  { %1071 = vmatpush.msra.mxu3 %v993_v15  ;;  %v994_v15 = vld [vmem:[%s2393_s8 + $0xd8] sm:$0xff] }
 0xcb6   :  { %v603_v17 = vpop.f32.mrf.mxu3 }
 0xcb7   :  { %v607_v18 = vrot.slane %v603_v17, 4  ;;  %v991_v17 = vld [vmem:[%s2393_s8 + $0xc0] sm:$0xff] }
 0xcb8   :  { %1072 = vmatpush.msra.mxu3 %v991_v17  ;;  %v1023_v17 = vld [vmem:[%s2393_s8 + $0x1c0] sm:$0xff] }
 0xcb9   :  { %v609_v19 = vadd.f32 %v607_v18, %v153_v44  ;;  %v841_v44 = vld [vmem:[%s2391_s6 + $0x28] sm:$0xff]  ;;  %v989_v18 = vld [vmem:[%s2393_s8 + $0xb0] sm:$0xff] }
 0xcba   :  { %940 = vmatpush.msra.mxu2 %v841_v44  ;;  %1073 = vmatpush.msra.mxu3 %v989_v18  ;;  %v1055_v18 = vld [vmem:[%s2393_s8 + $0x2c0] sm:$0xff] }
 0xcbb   :  { %1487 = vtanh.f32 %v609_v19  ;;  %v1417_v21 = vmul.f32 -1.442695, %v609_v19  ;;  %v987_v19 = vld [vmem:[%s2393_s8 + $0xa0] sm:$0xff] }
 0xcbc   :  { %941 = vmatpush.msra.mxu2 %v838_v45  ;;  %1074 = vmatpush.msra.mxu3 %v987_v19  ;;  %v992_v19 = vld [vmem:[%s2393_s8 + $0xc8] sm:$0xff] }
 0xcbd   :  { %1489 = vpow2.f32 %v1417_v21  ;;  %v983_v21 = vld [vmem:[%s2393_s8 + $0x80] sm:$0xff] }
 0xcc1   :  { %v1488_v20 = vpop.eup %1487 }
 0xcc2   :  { %638 = vrot.lane.b32.xlu0 %v1488_v20, %s1564_s2  ;;  %v985_v20 = vld [vmem:[%s2393_s8 + $0x90] sm:$0xff] }
 0xcc3   :  { %v1490_v22 = vpop.eup %1489  ;;  %1075 = vmatpush.msra.mxu3 %v985_v20  ;;  %v1021_v20 = vld [vmem:[%s2393_s8 + $0x1b0] sm:$0xff] }
 0xcc4   :  { %v613_v23 = vadd.f32 1.0, %v1490_v22 }
 0xcc5   :  { %1076 = vmatpush.msra.mxu3 %v983_v21  ;;  %v1053_v21 = vld [vmem:[%s2393_s8 + $0x2b0] sm:$0xff] }
 0xcc6   :  { %1491 = vrcp.f32 %v613_v23  ;;  %v625_v8 = vand.u32 2147483648, %v613_v23  ;;  %vm619_vm12 = vweird.f32 %v613_v23  ;;  %v623_v26 = vand.u32 2147483647, %v613_v23 }
 0xcc8   :  { %v626_v28 = vor.u32 1.1754944e-38, %v625_v8  ;;  %vm624_vm14 = vcmp.eq.f32.partialorder %v623_v26, 8.507059e+37  ;;  %v975_v8 = vld [vmem:[%s2393_s8 + $0x40] sm:$0xff]  ;;  %v973_v26 = vld [vmem:[%s2393_s8 + $0x30] sm:$0xff] }
 0xccc   :  { %v1492_v2 = vpop.eup %1491 }
 0xccd   :  { %v615_v24 = vmul.f32 %v1492_v2, %v613_v23  ;;  %vm620_vm10 = vweird.f32 %v1492_v2 }
 0xcce   :  { %vm621_vm13 = vmor %vm619_vm12, %vm620_vm10 }
 0xccf   :  { %v616_v3 = vsub.f32 1.0, %v615_v24 }
 0xcd1   :  { %v617_v25 = vmul.f32 %v1492_v2, %v616_v3  ;;  %v981_v3 = vld [vmem:[%s2393_s8 + $0x70] sm:$0xff] }
 0xcd2   :  { %1077 = vmatpush.msra.mxu3 %v981_v3  ;;  %v988_v3 = vld [vmem:[%s2393_s8 + $0xa8] sm:$0xff] }
 0xcd3   :  { %v618_v5 = vadd.f32 %v1492_v2, %v617_v25  ;;  %v979_v25 = vld [vmem:[%s2393_s8 + $0x60] sm:$0xff] }
 0xcd4   :  { %1078 = vmatpush.msra.mxu3 %v979_v25  ;;  %v1017_v25 = vld [vmem:[%s2393_s8 + $0x190] sm:$0xff] }
 0xcd5   :  { %v622_v27 = vsel %vm621_vm13, %v1492_v2, %v618_v5  ;;  %v977_v5 = vld [vmem:[%s2393_s8 + $0x50] sm:$0xff] }
 0xcd6   :  { %v627_v30 = vsel %vm624_vm14, %v626_v28, %v622_v27  ;;  %1079 = vmatpush.msra.mxu3 %v977_v5  ;;  %v971_v27 = vld [vmem:[%s2393_s8 + $0x20] sm:$0xff]  ;;  %v969_v28 = vld [vmem:[%s2393_s8 + $0x10] sm:$0xff] }
 0xcd7   :  { %v636_v33 = vmul.f32 %v634_v32, %v627_v30  ;;  %v1049_v5 = vld [vmem:[%s2393_s8 + $0x290] sm:$0xff] }
 0xcd8   :  { %1080 = vmatpush.msra.mxu3 %v975_v8  ;;  %v986_v8 = vld [vmem:[%s2393_s8 + $0x98] sm:$0xff] }
 0xcda   :  { %1081 = vmatpush.msra.mxu3 %v973_v26  ;;  %v1015_v26 = vld [vmem:[%s2393_s8 + $0x180] sm:$0xff] }
 0xcdc   :  { %1082 = vmatpush.msra.mxu3 %v971_v27  ;;  %v1047_v27 = vld [vmem:[%s2393_s8 + $0x280] sm:$0xff] }
 0xcde   :  { %1083 = vmatpush.msra.mxu3 %v969_v28  ;;  %v984_v28 = vld [vmem:[%s2393_s8 + $0x88] sm:$0xff] }
 0xd34   :  { %v639_v29 = vpop.permute.xlu0 %638 }
 0xd35   :  { %v641_v31 = vmul.f32 %v639_v29, %v627_v30  ;;  %v967_v29 = vld [vmem:[%s2393_s8] sm:$0xff] }
 0xd36   :  { %1084 = vmatpush.msra.mxu3 %v967_v29 }
 0xd37   :  { %643 = vrot.lane.b32.xlu2 %v641_v31, %s1565_s18  ;;  %v1931_v31 = vld [vmem:[%s2392_s7] sm:$0x7] }
 0xd38   :  { %v1934_v32 = vperm.slane %v1931_v31, 0 }
 0xd91   :  { %v644_v34 = vpop.permute.xlu2 %643 }
 0xd92   :  { %v646_v12 = vadd.f32 %v644_v34, %v636_v33  ;;  %v885_v33 = vpop.f32.mrf.mxu0 }
 0xd94   :  { %1493 = vtanh.f32 %v646_v12  ;;  %654 = vrot.lane.b32.xlu2 %v646_v12, %s1566_s4  ;;  %v1938_v12 = vadd.f32 %v885_v33, %v1934_v32  ;;  %v1013_v33 = vld [vmem:[%s2393_s8 + $0x170] sm:$0xff] }
 0xd9a   :  { %v1494_v35 = vpop.eup %1493 }
 0xd9b   :  { %649 = vrot.lane.b32.xlu0 %v1494_v35, %s1564_s2  ;;  %v955_v35 = vmax.f32 %v1938_v12, 0.0  ;;  %v1012_v12 = vld [vmem:[%s2393_s8 + $0x168] sm:$0xff] }
 0xdee   :  { %v655_v36 = vpop.permute.xlu2 %654 }
 0xdef   :  { %657 = vst.msk [vmem:[#allocation3 - $0x4] sm:$0xf0] %vm320_vm11, %v655_v36  ;;  %v888_v36 = vpop.f32.mrf.mxu0 }
 0xdf6   :  { %v713_v39 = vld [vmem:[#allocation3] sm:$0xf] }
 0xe0d   :  { %v650_v37 = vpop.permute.xlu0 %649 }
 0xe0e   :  { %v652_v38 = vmul.f32 %v650_v37, %v627_v30  ;;  %v1944_v37 = vadd.f32 %v888_v36, %v1934_v32  ;;  %v982_v36 = vld [vmem:[%s2393_s8 + $0x78] sm:$0xff] }
 0xe10   :  { %659 = vrot.lane.b32.xlu1 %v652_v38, %s1565_s18  ;;  %v958_v38 = vmax.f32 %v1944_v37, 0.0  ;;  %v1044_v37 = vld [vmem:[%s2393_s8 + $0x268] sm:$0xff] }
 0xe18   :  { %715 = vrot.lane.b32.xlu1 %v713_v39, %s1565_s18 }
 0xe82   :  { %v660_v46 = vpop.permute.xlu1 %659 }
 0xe83   :  { %662 = vst.msk [vmem:[#allocation2 - $0x4] sm:$0xf0] %vm320_vm11, %v660_v46 }
 0xe84   :  { %663 = vst.msk [vmem:[#allocation4 + $0x10] sm:$0xf0] %vm320_vm11, %v660_v46 }
 0xe8a   :  { %v664_v47 = vld [vmem:[#allocation2] sm:$0xf]  ;;  %v716_v4 = vpop.permute.xlu1 %715 }
 0xe8b   :  { %1418 = vmatmul.msk.f32.vlgmr.msrb.gmra.mxu2 %vm116_vm2, %v664_v47  ;;  %v834_v48 = vld [vmem:[#allocation4 + $0x10] sm:$0xff] }
 0xe8c   :  { %1424 = vmatmul.msk.f32.gmra.mxu0 %vm116_vm2, %v834_v48  ;;  %1428 = vmatmul.msk.f32.gmra.mxu1 %vm116_vm2, %v834_v48 }
 0xe93   :  { %1430 = vmatmul.msk.f32.vlgmr.msra.gmra.mxu2 %vm116_vm2, %v1786_v41 }
 0xe9b   :  { %1431 = vmatmul.msk.f32.gmra.mxu2 %vm116_vm2, %v1821_v42 }
 0xea3   :  { %1432 = vmatmul.msk.f32.gmra.mxu2 %vm116_vm2, %v834_v48 }
 0xf09   :  { %v891_v39 = vpop.f32.mrf.mxu0 }
 0xf0a   :  { %v1950_v40 = vadd.f32 %v891_v39, %v1934_v32  ;;  %v1011_v39 = vld [vmem:[%s2393_s8 + $0x160] sm:$0xff] }
 0xf0c   :  { %v961_v43 = vmax.f32 %v1950_v40, 0.0  ;;  %v1259_v40 = vld [vmem:[%s2395_s10 + $0x40] sm:$0xff] }
 0xf0e   :  { %v689_v51 = vpop.f32.mrf.mxu2 }
 0xf0f   :  { %v692_v52 = vadd.f32 %v689_v51, %v1868_v50 }
 0xf11   :  { %1495 = vtanh.f32 %v692_v52  ;;  %v1419_v54 = vmul.f32 -1.442695, %v692_v52 }
 0xf13   :  { %1497 = vpow2.f32 %v1419_v54 }
 0xf17   :  { %v1496_v53 = vpop.eup %1495 }
 0xf18   :  { %720 = vrot.lane.b32.xlu0 %v1496_v53, %s1564_s2 }
 0xf19   :  { %v1498_v55 = vpop.eup %1497 }
 0xf1a   :  { %v696_v41 = vadd.f32 1.0, %v1498_v55 }
 0xf1c   :  { %1499 = vrcp.f32 %v696_v41  ;;  %v708_v16 = vand.u32 2147483648, %v696_v41  ;;  %vm702_vm0 = vweird.f32 %v696_v41  ;;  %v706_v60 = vand.u32 2147483647, %v696_v41 }
 0xf1e   :  { %v709_v62 = vor.u32 1.1754944e-38, %v708_v16  ;;  %vm707_vm4 = vcmp.eq.f32.partialorder %v706_v60, 8.507059e+37 }
 0xf22   :  { %v1500_v56 = vpop.eup %1499 }
 0xf23   :  { %v698_v42 = vmul.f32 %v1500_v56, %v696_v41  ;;  %vm703_vm15 = vweird.f32 %v1500_v56 }
 0xf24   :  { %vm704_vm3 = vmor %vm702_vm0, %vm703_vm15 }
 0xf25   :  { %v699_v57 = vsub.f32 1.0, %v698_v42 }
 0xf27   :  { %v700_v58 = vmul.f32 %v1500_v56, %v699_v57 }
 0xf29   :  { %v701_v59 = vadd.f32 %v1500_v56, %v700_v58 }
 0xf2b   :  { %v705_v61 = vsel %vm704_vm3, %v1500_v56, %v701_v59 }
 0xf2c   :  { %v710_v0 = vsel %vm707_vm4, %v709_v62, %v705_v61 }
 0xf2d   :  { %v718_v6 = vmul.f32 %v716_v4, %v710_v0  ;;  %v1029_v4 = vld [vmem:[%s2393_s8 + $0x1f0] sm:$0xff] }
 0xf2e   :  { %1098 = vmatpush.msra.mxu0 %v1029_v4  ;;  %v943_v4 = vpop.f32.mrf.mxu2 }
 0xf8a   :  { %v721_v63 = vpop.permute.xlu0 %720 }
 0xf8b   :  { %v723_v1 = vmul.f32 %v721_v63, %v710_v0 }
 0xf8d   :  { %725 = vrot.lane.b32.xlu2 %v723_v1, %s1565_s18 }
 0xfe7   :  { %v726_v7 = vpop.permute.xlu2 %725 }
 0xfe8   :  { %v728_v9 = vadd.f32 %v726_v7, %v718_v6  ;;  %v1061_v6 = vld [vmem:[%s2393_s8 + $0x2f0] sm:$0xff]  ;;  %v998_v7 = vld [vmem:[%s2393_s8 + $0xf8] sm:$0xff] }
 0xfe9   :  { %1127 = vmatpush.msra.mxu1 %v1061_v6  ;;  %1156 = vmatpush.msrb.mxu2 %v998_v7  ;;  %v1026_v6 = vld [vmem:[%s2393_s8 + $0x1d8] sm:$0xff] }
 0xfea   :  { %1501 = vtanh.f32 %v728_v9  ;;  %736 = vrot.lane.b32.xlu2 %v728_v9, %s1566_s4  ;;  %v1027_v9 = vld [vmem:[%s2393_s8 + $0x1e0] sm:$0xff]  ;;  %v1058_v7 = vld [vmem:[%s2393_s8 + $0x2d8] sm:$0xff] }
 0xfeb   :  { %1099 = vmatpush.msra.mxu0 %v1027_v9  ;;  %v1266_v9 = vld [vmem:[%s2395_s10 + $0x78] sm:$0xff] }
 0xfed   :  { %1100 = vmatpush.msra.mxu0 %v1025_v13  ;;  %v2142_v13 = vperm.slane %v1931_v31, 2 }
 0xfef   :  { %1101 = vmatpush.msra.mxu0 %v1023_v17 }
 0xff0   :  { %v1502_v10 = vpop.eup %1501 }
 0xff1   :  { %731 = vrot.lane.b32.xlu0 %v1502_v10, %s1564_s2  ;;  %v1059_v10 = vld [vmem:[%s2393_s8 + $0x2e0] sm:$0xff]  ;;  %1102 = vmatpush.msra.mxu0 %v1021_v20  ;;  %v1054_v20 = vld [vmem:[%s2393_s8 + $0x2b8] sm:$0xff] }
 0xff2   :  { %1128 = vmatpush.msra.mxu1 %v1059_v10  ;;  %v1265_v10 = vld [vmem:[%s2395_s10 + $0x70] sm:$0xff] }
 0xff4   :  { %1129 = vmatpush.msra.mxu1 %v1057_v14  ;;  %v1024_v14 = vld [vmem:[%s2393_s8 + $0x1c8] sm:$0xff] }
 0xff6   :  { %1130 = vmatpush.msra.mxu1 %v1055_v18  ;;  %v1056_v18 = vld [vmem:[%s2393_s8 + $0x2c8] sm:$0xff] }
 0xff8   :  { %1131 = vmatpush.msra.mxu1 %v1053_v21  ;;  %v1263_v21 = vld [vmem:[%s2395_s10 + $0x60] sm:$0xff] }
0x1044   :  { %v737_v11 = vpop.permute.xlu2 %736 }
0x1045   :  { %739 = vst.msk [vmem:[#allocation3] sm:$0xf] %vm50_vm1, %v737_v11  ;;  %v996_v11 = vld [vmem:[%s2393_s8 + $0xe8] sm:$0xff] }
0x1046   :  { %1157 = vmatpush.msrb.mxu2 %v996_v11  ;;  %v2139_v11 = vperm.slane %v1931_v31, 1  ;;  %v1022_v31 = vld [vmem:[%s2393_s8 + $0x1b8] sm:$0xff] }
0x1048   :  { %1158 = vmatpush.msrb.mxu2 %v994_v15  ;;  %v914_v15 = vpop.f32.mrf.mxu1 }
0x104a   :  { %1159 = vmatpush.msrb.mxu2 %v992_v19  ;;  %v1264_v19 = vld [vmem:[%s2395_s10 + $0x68] sm:$0xff] }
0x104c   :  { %v798_v2 = vld [vmem:[#allocation3] sm:$0xf] }
0x104d   :  { %v800_v24 = vrot.slane %v798_v2, 4  ;;  %v1051_v2 = vld [vmem:[%s2393_s8 + $0x2a0] sm:$0xff] }
0x104e   :  { %1132 = vmatpush.msra.mxu1 %v1051_v2  ;;  %v2169_v2 = vadd.f32 %v943_v4, %v2142_v13  ;;  %v1253_v4 = vld [vmem:[%s2395_s10 + $0x10] sm:$0xff] }
0x1050   :  { %1133 = vmatpush.msra.mxu1 %v1049_v5  ;;  %v1018_v5 = vld [vmem:[%s2393_s8 + $0x198] sm:$0xff] }
0x1052   :  { %1134 = vmatpush.msra.mxu1 %v1047_v27  ;;  %v957_v27 = vmax.f32 %v2169_v2, 0.0 }
0x1063   :  { %v732_v22 = vpop.permute.xlu0 %731 }
0x1064   :  { %v734_v23 = vmul.f32 %v732_v22, %v710_v0  ;;  %v990_v22 = vld [vmem:[%s2393_s8 + $0xb8] sm:$0xff] }
0x1065   :  { %1160 = vmatpush.msrb.mxu2 %v990_v22 }
0x1066   :  { %741 = vrot.lane.b32.xlu1 %v734_v23, %s1565_s18  ;;  %v1019_v23 = vld [vmem:[%s2393_s8 + $0x1a0] sm:$0xff] }
0x1067   :  { %1103 = vmatpush.msra.mxu0 %v1019_v23  ;;  %1161 = vmatpush.msrb.mxu2 %v988_v3  ;;  %v2166_v23 = vadd.f32 %v914_v15, %v2139_v11  ;;  %v1052_v3 = vld [vmem:[%s2393_s8 + $0x2a8] sm:$0xff] }
0x1069   :  { %1104 = vmatpush.msra.mxu0 %v1017_v25  ;;  %1162 = vmatpush.msrb.mxu2 %v986_v8  ;;  %v1262_v25 = vld [vmem:[%s2395_s10 + $0x58] sm:$0xff]  ;;  %v946_v8 = vpop.f32.mrf.mxu2 }
0x106b   :  { %1105 = vmatpush.msra.mxu0 %v1015_v26  ;;  %1163 = vmatpush.msrb.mxu2 %v984_v28  ;;  %v956_v26 = vmax.f32 %v2166_v23, 0.0  ;;  %v1050_v28 = vld [vmem:[%s2393_s8 + $0x298] sm:$0xff] }
0x106d   :  { %1106 = vmatpush.msra.mxu0 %v1013_v33  ;;  %1164 = vmatpush.msrb.mxu2 %v982_v36  ;;  %v1261_v33 = vld [vmem:[%s2395_s10 + $0x50] sm:$0xff]  ;;  %v1014_v36 = vld [vmem:[%s2393_s8 + $0x178] sm:$0xff] }
0x106e   :  { %801 = vrot.lane.b32.xlu1 %v800_v24, %s1565_s18 }
0x106f   :  { %1107 = vmatpush.msra.mxu0 %v1011_v39 }
0x10d8   :  { %v742_v30 = vpop.permute.xlu1 %741 }
0x10d9   :  { %744 = vst.msk [vmem:[#allocation2] sm:$0xf] %vm50_vm1, %v742_v30 }
0x10da   :  { %745 = vst.msk [vmem:[#allocation4 + $0x18] sm:$0xf] %vm50_vm1, %v742_v30 }
0x10e0   :  { %v746_v34 = vld [vmem:[#allocation2] sm:$0xf]  ;;  %v802_v60 = vpop.permute.xlu1 %801 }
0x10e1   :  { %1420 = vmatmul.msk.f32.vlgmr.msrb.gmra.mxu3 %vm116_vm2, %v746_v34  ;;  %v1045_v34 = vld [vmem:[%s2393_s8 + $0x270] sm:$0xff] }
0x10e2   :  { %1135 = vmatpush.msra.mxu1 %v1045_v34  ;;  %v1048_v34 = vld [vmem:[%s2393_s8 + $0x288] sm:$0xff] }
0x10e9   :  { %1085 = vmatmul.f32.vlgmr.msra.gmra.mxu3 %v955_v35 }
0x10f1   :  { %1088 = vmatmul.f32.gmra.mxu3 %v958_v38 }
0x10f9   :  { %1091 = vmatmul.f32.gmra.mxu3 %v961_v43 }
0x1164   :  { %v771_v44 = vpop.f32.mrf.mxu3 }
0x1165   :  { %v775_v45 = vrot.slane %v771_v44, 4  ;;  %v1043_v44 = vld [vmem:[%s2393_s8 + $0x260] sm:$0xff] }
0x1166   :  { %1136 = vmatpush.msra.mxu1 %v1043_v44  ;;  %v2211_v44 = vadd.f32 %v946_v8, %v2142_v13 }
0x1167   :  { %v777_v46 = vadd.f32 %v775_v45, %v1868_v50  ;;  %v980_v45 = vld [vmem:[%s2393_s8 + $0x68] sm:$0xff] }
0x1168   :  { %1165 = vmatpush.msrb.mxu2 %v980_v45  ;;  %v1046_v45 = vld [vmem:[%s2393_s8 + $0x278] sm:$0xff] }
0x1169   :  { %1503 = vtanh.f32 %v777_v46  ;;  %v1421_v48 = vmul.f32 -1.442695, %v777_v46  ;;  %v1009_v46 = vld [vmem:[%s2393_s8 + $0x150] sm:$0xff] }
0x116a   :  { %1108 = vmatpush.msra.mxu0 %v1009_v46  ;;  %v960_v46 = vmax.f32 %v2211_v44, 0.0  ;;  %v1270_v44 = vld [vmem:[%s2395_s10 + $0x98] sm:$0xff] }
0x116b   :  { %1505 = vpow2.f32 %v1421_v48  ;;  %v978_v48 = vld [vmem:[%s2393_s8 + $0x58] sm:$0xff] }
0x116c   :  { %1166 = vmatpush.msrb.mxu2 %v978_v48  ;;  %v949_v48 = vpop.f32.mrf.mxu2  ;;  %v1086_v15 = vpop.f32.mrf.mxu3 }
0x116f   :  { %v1504_v47 = vpop.eup %1503 }
0x1170   :  { %806 = vrot.lane.b32.xlu0 %v1504_v47, %s1564_s2  ;;  %v1041_v47 = vld [vmem:[%s2393_s8 + $0x250] sm:$0xff] }
0x1171   :  { %v1506_v49 = vpop.eup %1505  ;;  %1137 = vmatpush.msra.mxu1 %v1041_v47 }
0x1172   :  { %v781_v51 = vadd.f32 1.0, %v1506_v49  ;;  %v1007_v49 = vld [vmem:[%s2393_s8 + $0x140] sm:$0xff] }
0x1173   :  { %1109 = vmatpush.msra.mxu0 %v1007_v49 }
0x1174   :  { %1507 = vrcp.f32 %v781_v51  ;;  %v793_v56 = vand.u32 2147483648, %v781_v51  ;;  %vm787_vm6 = vweird.f32 %v781_v51  ;;  %v791_v42 = vand.u32 2147483647, %v781_v51 }
0x1176   :  { %v794_v57 = vor.u32 1.1754944e-38, %v793_v56  ;;  %vm792_vm8 = vcmp.eq.f32.partialorder %v791_v42, 8.507059e+37  ;;  %v1035_v56 = vld [vmem:[%s2393_s8 + $0x220] sm:$0xff]  ;;  %v972_v42 = vld [vmem:[%s2393_s8 + $0x28] sm:$0xff] }
0x117a   :  { %v1508_v52 = vpop.eup %1507 }
0x117b   :  { %v783_v53 = vmul.f32 %v1508_v52, %v781_v51  ;;  %vm788_vm5 = vweird.f32 %v1508_v52  ;;  %v1039_v51 = vld [vmem:[%s2393_s8 + $0x240] sm:$0xff] }
0x117c   :  { %vm789_vm7 = vmor %vm787_vm6, %vm788_vm5  ;;  %1138 = vmatpush.msra.mxu1 %v1039_v51  ;;  %v2231_v51 = vadd.f32 %v949_v48, %v2142_v13 }
0x117d   :  { %v784_v54 = vsub.f32 1.0, %v783_v53  ;;  %v1005_v53 = vld [vmem:[%s2393_s8 + $0x130] sm:$0xff] }
0x117e   :  { %1110 = vmatpush.msra.mxu0 %v1005_v53  ;;  %v963_v53 = vmax.f32 %v2231_v51, 0.0 }
0x117f   :  { %v785_v55 = vmul.f32 %v1508_v52, %v784_v54  ;;  %v1037_v54 = vld [vmem:[%s2393_s8 + $0x230] sm:$0xff] }
0x1180   :  { %1139 = vmatpush.msra.mxu1 %v1037_v54  ;;  %v1010_v54 = vld [vmem:[%s2393_s8 + $0x158] sm:$0xff] }
0x1181   :  { %v786_v41 = vadd.f32 %v1508_v52, %v785_v55  ;;  %v974_v55 = vld [vmem:[%s2393_s8 + $0x38] sm:$0xff] }
0x1182   :  { %1140 = vmatpush.msra.mxu1 %v1035_v56  ;;  %v1258_v56 = vld [vmem:[%s2395_s10 + $0x38] sm:$0xff] }
0x1183   :  { %v790_v50 = vsel %vm789_vm7, %v1508_v52, %v786_v41  ;;  %v976_v52 = vld [vmem:[%s2393_s8 + $0x48] sm:$0xff]  ;;  %v1003_v41 = vld [vmem:[%s2393_s8 + $0x120] sm:$0xff] }
0x1184   :  { %v1957_v59 = vsel %vm792_vm8, %v794_v57, %v790_v50  ;;  %1167 = vmatpush.msrb.mxu2 %v976_v52  ;;  %v1001_v50 = vld [vmem:[%s2393_s8 + $0x110] sm:$0xff]  ;;  %1111 = vmatpush.msra.mxu0 %v1003_v41  ;;  %v1040_v41 = vld [vmem:[%s2393_s8 + $0x248] sm:$0xff] }
0x1185   :  { %v804_v61 = vmul.f32 %v802_v60, %v1957_v59  ;;  %v1033_v57 = vld [vmem:[%s2393_s8 + $0x210] sm:$0xff]  ;;  %v968_v60 = vld [vmem:[%s2393_s8 + $0x8] sm:$0xff] }
0x1186   :  { %1168 = vmatpush.msrb.mxu2 %v974_v55  ;;  %1112 = vmatpush.msra.mxu0 %v1001_v50  ;;  %v1042_v55 = vld [vmem:[%s2393_s8 + $0x258] sm:$0xff] }
0x1187   :  { %1141 = vmatpush.msra.mxu1 %v1033_v57  ;;  %v1038_v50 = vld [vmem:[%s2393_s8 + $0x238] sm:$0xff]  ;;  %v1257_v57 = vld [vmem:[%s2395_s10 + $0x30] sm:$0xff] }
0x1188   :  { %1169 = vmatpush.msrb.mxu2 %v972_v42  ;;  %v1006_v42 = vld [vmem:[%s2393_s8 + $0x138] sm:$0xff] }
0x11e2   :  { %v807_v58 = vpop.permute.xlu0 %806 }
0x11e3   :  { %v809_v16 = vmul.f32 %v807_v58, %v1957_v59  ;;  %v970_v58 = vld [vmem:[%s2393_s8 + $0x18] sm:$0xff] }
0x11e4   :  { %1170 = vmatpush.msrb.mxu2 %v970_v58  ;;  %v1004_v58 = vld [vmem:[%s2393_s8 + $0x128] sm:$0xff] }
0x11e5   :  { %811 = vrot.lane.b32.xlu2 %v809_v16, %s1565_s18  ;;  %v1031_v16 = vld [vmem:[%s2393_s8 + $0x200] sm:$0xff] }
0x11e6   :  { %1142 = vmatpush.msra.mxu1 %v1031_v16  ;;  %1171 = vmatpush.msrb.mxu2 %v968_v60  ;;  %v1256_v16 = vld [vmem:[%s2395_s10 + $0x28] sm:$0xff]  ;;  %v1002_v60 = vld [vmem:[%s2393_s8 + $0x118] sm:$0xff] }
0x11e8   :  { %1292 = vmatpush.msrb.mxu1 %v1266_v9 }
0x11ea   :  { %1293 = vmatpush.msrb.mxu1 %v1265_v10 }
0x11ec   :  { %1294 = vmatpush.msrb.mxu1 %v1264_v19 }
0x11ee   :  { %1295 = vmatpush.msrb.mxu1 %v1263_v21  ;;  %v1274_v21 = vld [vmem:[%s2395_s10 + $0xb8] sm:$0xff] }
0x11ef   :  { %1329 = vmatpush.msra.mxu2 %v1274_v21 }
0x11f0   :  { %1296 = vmatpush.msrb.mxu1 %v1262_v25  ;;  %v1272_v25 = vld [vmem:[%s2395_s10 + $0xa8] sm:$0xff] }
0x11f2   :  { %1297 = vmatpush.msrb.mxu1 %v1261_v33 }
0x123f   :  { %v812_v62 = vpop.permute.xlu2 %811 }
0x1240   :  { %v814_v63 = vadd.f32 %v812_v62, %v804_v61  ;;  %v1030_v62 = vld [vmem:[%s2393_s8 + $0x1f8] sm:$0xff] }
0x1241   :  { %1185 = vmatpush.msrb.mxu3 %v1030_v62  ;;  %v1255_v62 = vld [vmem:[%s2395_s10 + $0x20] sm:$0xff] }
0x1242   :  { %1509 = vtanh.f32 %v814_v63  ;;  %822 = vrot.lane.b32.xlu2 %v814_v63, %s1566_s4  ;;  %v1062_v63 = vld [vmem:[%s2393_s8 + $0x2f8] sm:$0xff] }
0x1248   :  { %v1510_v0 = vpop.eup %1509 }
0x1249   :  { %817 = vrot.lane.b32.xlu0 %v1510_v0, %s1564_s2  ;;  %v1028_v0 = vld [vmem:[%s2393_s8 + $0x1e8] sm:$0xff] }
0x124a   :  { %1186 = vmatpush.msrb.mxu3 %v1028_v0  ;;  %v1032_v0 = vld [vmem:[%s2393_s8 + $0x208] sm:$0xff] }
0x124c   :  { %1187 = vmatpush.msrb.mxu3 %v1026_v6  ;;  %v1252_v6 = vld [vmem:[%s2395_s10 + $0x8] sm:$0xff] }
0x124e   :  { %1188 = vmatpush.msrb.mxu3 %v1024_v14  ;;  %v2313_v14 = vld [vmem:[%s2394_s9] sm:$0x3] }
0x1250   :  { %1189 = vmatpush.msrb.mxu3 %v1022_v31 }
0x129c   :  { %v823_v1 = vpop.permute.xlu2 %822 }
0x129d   :  { %825 = vst.msk [vmem:[#allocation3 - $0x4] sm:$0xf0] %vm320_vm11, %v823_v1  ;;  %v1060_v1 = vld [vmem:[%s2393_s8 + $0x2e8] sm:$0xff] }
0x12a4   :  { %v1360_v24 = vld [vmem:[#allocation3] sm:$0xf] }
0x12a5   :  { %1361 = vst.msk [vmem:[#allocation7] sm:$0xf] %vm50_vm1, %v1360_v24  ;;  %v1020_v24 = vld [vmem:[%s2393_s8 + $0x1a8] sm:$0xff] }
0x12a6   :  { %1190 = vmatpush.msrb.mxu3 %v1020_v24 }
0x12a8   :  { %1191 = vmatpush.msrb.mxu3 %v1018_v5 }
0x12bb   :  { %v818_v29 = vpop.permute.xlu0 %817 }
0x12bc   :  { %v820_v30 = vmul.f32 %v818_v29, %v1957_v59  ;;  %v999_v59 = vld [vmem:[%s2393_s8 + $0x100] sm:$0xff]  ;;  %v917_v29 = vpop.f32.mrf.mxu1 }
0x12bd   :  { %1113 = vmatpush.msra.mxu0 %v999_v59  ;;  %v2208_v39 = vadd.f32 %v917_v29, %v2139_v11  ;;  %v1036_v59 = vld [vmem:[%s2393_s8 + $0x228] sm:$0xff]  ;;  %v1089_v29 = vpop.f32.mrf.mxu3 }
0x12be   :  { %827 = vrot.lane.b32.xlu1 %v820_v30, %s1565_s18  ;;  %v1016_v30 = vld [vmem:[%s2393_s8 + $0x188] sm:$0xff] }
0x12bf   :  { %1214 = vmatpush.msrb.mxu0 %v1062_v63  ;;  %1192 = vmatpush.msrb.mxu3 %v1016_v30  ;;  %v1000_v63 = vld [vmem:[%s2393_s8 + $0x108] sm:$0xff] }
0x12c1   :  { %1215 = vmatpush.msrb.mxu0 %v1060_v1  ;;  %1193 = vmatpush.msrb.mxu3 %v1014_v36  ;;  %v1254_v1 = vld [vmem:[%s2395_s10 + $0x18] sm:$0xff] }
0x12c3   :  { %1216 = vmatpush.msrb.mxu0 %v1058_v7  ;;  %1194 = vmatpush.msrb.mxu3 %v1012_v12  ;;  %v1251_v7 = vld [vmem:[%s2395_s10] sm:$0xff] }
0x12c4   :  { %v920_v47 = vpop.f32.mrf.mxu1 }
0x12c5   :  { %1217 = vmatpush.msrb.mxu0 %v1056_v18  ;;  %v2228_v49 = vadd.f32 %v920_v47, %v2139_v11  ;;  %1195 = vmatpush.msrb.mxu3 %v1010_v54  ;;  %v1092_v12 = vpop.f32.mrf.mxu3 }
0x12c7   :  { %1218 = vmatpush.msrb.mxu0 %v1054_v20  ;;  %v962_v52 = vmax.f32 %v2228_v49, 0.0  ;;  %v1065_v20 = vperm.slane %v2313_v14, 0  ;;  %v1267_v49 = vld [vmem:[%s2395_s10 + $0x80] sm:$0xff] }
0x12c9   :  { %1219 = vmatpush.msrb.mxu0 %v1052_v3  ;;  %v1093_v23 = vadd.f32 %v1092_v12, %v1065_v20 }
0x12cb   :  { %1220 = vmatpush.msrb.mxu0 %v1050_v28 }
0x12cd   :  { %1221 = vmatpush.msrb.mxu0 %v1048_v34 }
0x12cf   :  { %1222 = vmatpush.msrb.mxu0 %v1046_v45 }
0x12d1   :  { %1223 = vmatpush.msrb.mxu0 %v1044_v37 }
0x12d3   :  { %1224 = vmatpush.msrb.mxu0 %v1042_v55  ;;  %v1066_v55 = vperm.slane %v2313_v14, 1 }
0x12d5   :  { %1225 = vmatpush.msrb.mxu0 %v1040_v41 }
0x12d7   :  { %1226 = vmatpush.msrb.mxu0 %v1038_v50 }
0x12d9   :  { %1227 = vmatpush.msrb.mxu0 %v1036_v59 }
0x1330   :  { %v828_v61 = vpop.permute.xlu1 %827 }
0x1331   :  { %830 = vst.msk [vmem:[#allocation2 - $0x4] sm:$0xf0] %vm320_vm11, %v828_v61 }
0x1332   :  { %831 = vst.msk [vmem:[#allocation4 + $0x18] sm:$0xf0] %vm320_vm11, %v828_v61  ;;  %v1034_v61 = vld [vmem:[%s2393_s8 + $0x218] sm:$0xff] }
0x1333   :  { %1228 = vmatpush.msrb.mxu0 %v1034_v61 }
0x1335   :  { %1229 = vmatpush.msrb.mxu0 %v1032_v0 }
0x1338   :  { %v1358_v22 = vld [vmem:[#allocation2] sm:$0xf] }
0x1339   :  { %v835_v17 = vld [vmem:[#allocation4 + $0x18] sm:$0xff]  ;;  %1359 = vst.msk [vmem:[#allocation5] sm:$0xf] %vm50_vm1, %v1358_v22  ;;  %v1273_v22 = vld [vmem:[%s2395_s10 + $0xb0] sm:$0xff]  ;;  %vm1279_vm1 = vcmask 523264  }
0x133a   :  { %1425 = vmatmul.msk.f32.gmra.mxu0 %vm116_vm2, %v835_v17  ;;  %1429 = vmatmul.msk.f32.gmra.mxu1 %vm116_vm2, %v835_v17 }
0x133b   :  { %1433 = vmatmul.msk.f32.gmra.mxu2 %vm116_vm2, %v835_v17  ;;  %vm1350_vm2 = vcmask 23552  }
0x133c   :  { %1330 = vmatpush.msra.mxu2 %v1273_v22 }
0x133e   :  { %1331 = vmatpush.msra.mxu2 %v1272_v25 }
0x1342   :  { %1114 = vmatmul.f32.vlgmr.msra.gmra.mxu0 %v956_v26  ;;  %1143 = vmatmul.f32.vlgmr.msra.gmra.mxu1 %v957_v27 }
0x1343   :  { %1172 = vmatmul.f32.vlgmr.msrb.gmra.mxu2 %v955_v35  ;;  %v959_v35 = vmax.f32 %v2208_v39, 0.0  ;;  %v1271_v39 = vld [vmem:[%s2395_s10 + $0xa0] sm:$0xff] }
0x1344   :  { %1332 = vmatpush.msra.mxu2 %v1271_v39 }
0x1346   :  { %1333 = vmatpush.msra.mxu2 %v1270_v44 }
0x134a   :  { %1117 = vmatmul.f32.gmra.mxu0 %v959_v35  ;;  %1146 = vmatmul.f32.gmra.mxu1 %v960_v46 }
0x134b   :  { %1175 = vmatmul.f32.gmra.mxu2 %v958_v38  ;;  %v1260_v38 = vld [vmem:[%s2395_s10 + $0x48] sm:$0xff] }
0x134c   :  { %1298 = vmatpush.msrb.mxu1 %v1260_v38 }
0x134e   :  { %1299 = vmatpush.msrb.mxu1 %v1259_v40 }
0x1350   :  { %1300 = vmatpush.msrb.mxu1 %v1258_v56 }
0x1352   :  { %1120 = vmatmul.f32.gmra.mxu0 %v962_v52  ;;  %1149 = vmatmul.f32.gmra.mxu1 %v963_v53 }
0x1353   :  { %1178 = vmatmul.f32.gmra.mxu2 %v961_v43  ;;  %v1008_v43 = vld [vmem:[%s2393_s8 + $0x148] sm:$0xff]  ;;  %1301 = vmatpush.msrb.mxu1 %v1257_v57  ;;  %s1382_s8 = sshll.u32 %s2399_s14, 4  ;;  %s1383_s8 = int_to_ptr.hbm [resolvable:$true] %s1382_s8 }
0x1354   :  { %1196 = vmatpush.msrb.mxu3 %v1008_v43  ;;  %1385 = dma.vmem_to_hbm [thread:$0]  %s1381_s22, 64, %s1383_s8, [#allocation8]  }
0x1355   :  { %1302 = vmatpush.msrb.mxu1 %v1256_v16 }
0x1356   :  { %1197 = vmatpush.msrb.mxu3 %v1006_v42 }
0x1357   :  { %1303 = vmatpush.msrb.mxu1 %v1255_v62 }
0x1358   :  { %1198 = vmatpush.msrb.mxu3 %v1004_v58 }
0x1359   :  { %1304 = vmatpush.msrb.mxu1 %v1254_v1 }
0x135a   :  { %1199 = vmatpush.msrb.mxu3 %v1002_v60 }
0x135b   :  { %1305 = vmatpush.msrb.mxu1 %v1253_v4 }
0x135c   :  { %1200 = vmatpush.msrb.mxu3 %v1000_v63 }
0x135d   :  { %1306 = vmatpush.msrb.mxu1 %v1252_v6 }
0x135f   :  { %1307 = vmatpush.msrb.mxu1 %v1251_v7 }
0x13b7   :  { %v894_v9 = vpop.f32.mrf.mxu0  ;;  %v923_v10 = vpop.f32.mrf.mxu1 }
0x13b8   :  { %v895_v17 = vadd.f32 %v894_v9, %v1934_v32  ;;  %v924_v18 = vadd.f32 %v923_v10, %v2139_v11  ;;  %v1087_v32 = vadd.f32 %v1086_v15, %v1065_v20 }
0x13ba   :  { %v964_v19 = vmax.f32 %v895_v17, 0.0  ;;  %v965_v31 = vmax.f32 %v924_v18, 0.0 }
0x13bc   :  { %1094 = vmatmul.f32.gmra.mxu3 %v964_v19  ;;  %1123 = vmatmul.f32.gmra.mxu0 %v965_v31 }
0x13bd   :  { %1181 = vmatmul.f32.gmra.mxu2 %v964_v19 }
0x13be   :  { %v952_v24 = vpop.f32.mrf.mxu2 }
0x13bf   :  { %v953_v11 = vadd.f32 %v952_v24, %v2142_v13  ;;  %v1115_v3 = vpop.f32.mrf.mxu0  ;;  %v1144_v5 = vpop.f32.mrf.mxu1  ;;  %v1090_v13 = vadd.f32 %v1089_v29, %v1065_v20 }
0x13c0   :  { %v1116_v28 = vadd.f32 %v1115_v3, %v1087_v32 }
0x13c1   :  { %v966_v8 = vmax.f32 %v953_v11, 0.0  ;;  %v1446_v11 = vld [vmem:[%s2396_s11] ss:$0 sm:$0xff] }
0x13c2   :  { %v1145_v30 = vadd.f32 %v1144_v5, %v1116_v28 }
0x13c3   :  { %1152 = vmatmul.f32.gmra.mxu1 %v966_v8 }
0x13c4   :  { %1201 = vmatmul.f32.vlgmr.msrb.gmra.mxu3 %v956_v26  ;;  %1230 = vmatmul.f32.vlgmr.msrb.gmra.mxu0 %v957_v27  ;;  %v1243_v34 = vmax.f32 %v1145_v30, 0.0 }
0x13c7   :  { %v1118_v33 = vpop.f32.mrf.mxu0  ;;  %v1147_v45 = vpop.f32.mrf.mxu1 }
0x13c8   :  { %v1119_v36 = vadd.f32 %v1118_v33, %v1090_v13 }
0x13ca   :  { %v1148_v47 = vadd.f32 %v1147_v45, %v1119_v36 }
0x13cb   :  { %1308 = vmatmul.f32.vlgmr.msrb.gmra.mxu1 %v1243_v34 }
0x13cc   :  { %1204 = vmatmul.f32.gmra.mxu3 %v959_v35  ;;  %1233 = vmatmul.f32.gmra.mxu0 %v960_v46  ;;  %v1245_v48 = vmax.f32 %v1148_v47, 0.0  ;;  %v1269_v35 = vld [vmem:[%s2395_s10 + $0x90] sm:$0xff]  ;;  %v1268_v46 = vld [vmem:[%s2395_s10 + $0x88] sm:$0xff]  ;;  %s1567_s10 = smov [#allocation5]  }
0x13cd   :  { %1334 = vmatpush.msra.mxu2 %v1269_v35  ;;  %s1369_s17 = sshll.u32 %s1567_s10, 4  ;;  %s1370_s17 = int_to_ptr.vmem [resolvable:$true] %s1369_s17 }
0x13ce   :  { %1374 = dma.vmem_to_hbm [thread:$0]  %s1370_s17, 64, %s1372_s21, [#allocation6]  }
0x13cf   :  { %v1121_v26 = vpop.f32.mrf.mxu0  ;;  %v1150_v27 = vpop.f32.mrf.mxu1  ;;  %1335 = vmatpush.msra.mxu2 %v1268_v46 }
0x13d0   :  { %v1122_v2 = vadd.f32 %v1121_v26, %v1093_v23 }
0x13d1   :  { %1336 = vmatpush.msra.mxu2 %v1267_v49 }
0x13d2   :  { %v1151_v37 = vadd.f32 %v1150_v27, %v1122_v2 }
0x13d3   :  { %1311 = vmatmul.f32.gmra.mxu1 %v1245_v48 }
0x13d4   :  { %1207 = vmatmul.f32.gmra.mxu3 %v962_v52  ;;  %1236 = vmatmul.f32.gmra.mxu0 %v963_v53  ;;  %v1247_v38 = vmax.f32 %v1151_v37, 0.0  ;;  %v1173_v52 = vpop.f32.mrf.mxu2 }
0x13d5   :  { %v1174_v42 = vadd.f32 %v1173_v52, %v1066_v55 }
0x13db   :  { %1314 = vmatmul.f32.gmra.mxu1 %v1247_v38 }
0x13dc   :  { %1210 = vmatmul.f32.gmra.mxu3 %v965_v31  ;;  %1239 = vmatmul.f32.gmra.mxu0 %v966_v8  ;;  %v1176_v59 = vpop.f32.mrf.mxu2 }
0x13dd   :  { %v1177_v62 = vadd.f32 %v1176_v59, %v1066_v55 }
0x13e4   :  { %v1179_v4 = vpop.f32.mrf.mxu2 }
0x13e5   :  { %v1180_v7 = vadd.f32 %v1179_v4, %v1066_v55 }
0x1439   :  { %v1124_v51 = vpop.f32.mrf.mxu0 }
0x143f   :  { %v1095_v53 = vpop.f32.mrf.mxu3 }
0x1440   :  { %v1096_v54 = vadd.f32 %v1095_v53, %v1065_v20  ;;  %v1153_v43 = vpop.f32.mrf.mxu1  ;;  %v1182_v17 = vpop.f32.mrf.mxu2 }
0x1441   :  { %v1231_v41 = vpop.f32.mrf.mxu0  ;;  %v1183_v19 = vadd.f32 %v1182_v17, %v1066_v55 }
0x1442   :  { %v1125_v40 = vadd.f32 %v1124_v51, %v1096_v54 }
0x1444   :  { %v1154_v56 = vadd.f32 %v1153_v43, %v1125_v40 }
0x1446   :  { %v1249_v50 = vmax.f32 %v1154_v56, 0.0 }
0x1447   :  { %v1202_v57 = vpop.f32.mrf.mxu3 }
0x1448   :  { %v1203_v58 = vadd.f32 %v1202_v57, %v1174_v42  ;;  %1317 = vmatmul.f32.gmra.mxu1 %v1249_v50  ;;  %v1309_v32 = vpop.f32.mrf.mxu1 }
0x1449   :  { %v1234_v61 = vpop.f32.mrf.mxu0  ;;  %v1310_v3 = vadd.f32 %v1446_v11, %v1309_v32 }
0x144a   :  { %v1232_v16 = vadd.f32 %v1231_v41, %v1203_v58 }
0x144c   :  { %v1244_v60 = vmax.f32 %v1232_v16, 0.0 }
0x144e   :  { %1434 = vmatmul.msk.f32.vlgmr.msra.gmra.mxu2 %vm1279_vm1, %v1244_v60 }
0x144f   :  { %v1205_v63 = vpop.f32.mrf.mxu3 }
0x1450   :  { %v1206_v0 = vadd.f32 %v1205_v63, %v1177_v62  ;;  %v1312_v8 = vpop.f32.mrf.mxu1 }
0x1451   :  { %v1237_v9 = vpop.f32.mrf.mxu0  ;;  %v1313_v28 = vadd.f32 %v1446_v11, %v1312_v8 }
0x1452   :  { %v1235_v1 = vadd.f32 %v1234_v61, %v1206_v0 }
0x1454   :  { %v1246_v6 = vmax.f32 %v1235_v1, 0.0 }
0x1456   :  { %1435 = vmatmul.msk.f32.gmra.mxu2 %vm1279_vm1, %v1246_v6 }
0x1457   :  { %v1208_v10 = vpop.f32.mrf.mxu3 }
0x1458   :  { %v1209_v14 = vadd.f32 %v1208_v10, %v1180_v7  ;;  %v1315_v13 = vpop.f32.mrf.mxu1 }
0x1459   :  { %v1240_v21 = vpop.f32.mrf.mxu0  ;;  %v1316_v33 = vadd.f32 %v1446_v11, %v1315_v13 }
0x145a   :  { %v1238_v15 = vadd.f32 %v1237_v9, %v1209_v14 }
0x145c   :  { %v1248_v18 = vmax.f32 %v1238_v15, 0.0 }
0x145e   :  { %1436 = vmatmul.msk.f32.gmra.mxu2 %vm1279_vm1, %v1248_v18 }
0x145f   :  { %v1211_v31 = vpop.f32.mrf.mxu3 }
0x1460   :  { %v1212_v20 = vadd.f32 %v1211_v31, %v1183_v19 }
0x1462   :  { %v1241_v22 = vadd.f32 %v1240_v21, %v1212_v20 }
0x1464   :  { %v1250_v24 = vmax.f32 %v1241_v22, 0.0 }
0x1466   :  { %1437 = vmatmul.msk.f32.gmra.mxu2 %vm1279_vm1, %v1250_v24 }
0x14c5   :  { %v1318_v45 = vpop.f32.mrf.mxu1 }
0x14c6   :  { %v1319_v12 = vadd.f32 %v1446_v11, %v1318_v45 }
0x14d1   :  { %v1338_v25 = vpop.f32.mrf.mxu2 }
0x14d2   :  { %v1339_v5 = vadd.f32 %v1338_v25, %v1310_v3 }
0x14d4   :  { %1351 = vst.msk [vmem:[%s2397_s12] sm:$0xff] %vm1350_vm2, %v1339_v5 }
0x14d9   :  { %v1341_v29 = vpop.f32.mrf.mxu2 }
0x14da   :  { %v1342_v30 = vadd.f32 %v1341_v29, %v1313_v28 }
0x14dc   :  { %1352 = vst.msk [vmem:[%s2397_s12 + $0x8] sm:$0xff] %vm1350_vm2, %v1342_v30 }
0x14e1   :  { %v1344_v34 = vpop.f32.mrf.mxu2 }
0x14e2   :  { %v1345_v36 = vadd.f32 %v1344_v34, %v1316_v33 }
0x14e4   :  { %1353 = vst.msk [vmem:[%s2397_s12 + $0x10] sm:$0xff] %vm1350_vm2, %v1345_v36 }
0x14e9   :  { %v1347_v47 = vpop.f32.mrf.mxu2 }
0x14ea   :  { %v1348_v23 = vadd.f32 %v1347_v47, %v1319_v12 }
0x14ec   :  { %1354 = vst.msk [vmem:[%s2397_s12 + $0x18] sm:$0xff] %vm1350_vm2, %v1348_v23 }
0x14ed   :  { %1559 = dma.done.wait [#allocation6], 64  }
0x14ee   :  { %1560 = vsyncadd [#allocation6], 4294967232 }
0x14ef   :  { %1561 = dma.done.wait [#allocation8], 64  }
0x14f0   :  { %1562 = vsyncadd [#allocation8], 4294967232 }
0x14f1   :  { %1396 = vsyncpa [#allocation6], 1 }
0x14f2   :  { %1397 = vsyncpa [#allocation8], 1 }

</bundles_post_ra>
